<compile_context>
chip_gen: v6e
topology: v6e:2x2x1
jax: 0.10.0
libtpu: 0.0.40
codegen_flags: <defaults>
</compile_context>

<pallas_src>
import jax
import jax.numpy as jnp
from jax.experimental import pallas as pl
from jax.experimental.pallas import tpu as pltpu


def dwconv_kernel(x_ref, w_ref, b_ref, o_ref, xpad_ref):
    # x_ref   : (1, H, W, Ct)   unpadded input tile
    # w_ref   : (3, 3, Ct)      depthwise weights for this channel tile
    # b_ref   : (1, Ct)         bias for this channel tile
    # o_ref   : (1, H, W, Ct)   output tile
    # xpad_ref: (H+2, W+2, Ct)  fp32 VMEM scratch holding the halo'd input
    H = o_ref.shape[1]
    W = o_ref.shape[2]
    ct = o_ref.shape[3]

    # Hoisted parameter casts (done once, not once per tap).
    w = w_ref[...].astype(jnp.float32)   # (3, 3, Ct)
    b = b_ref[...].astype(jnp.float32)   # (1, Ct)

    # Build the zero halo in VMEM (replaces the HBM jnp.pad pass).  The border is
    # rewritten every grid step, so correctness never depends on scratch state
    # surviving across steps or cores.
    zrow = jnp.zeros((1, W + 2, ct), jnp.float32)
    zcol = jnp.zeros((H, 1, ct), jnp.float32)
    xpad_ref[0:1, :, :] = zrow
    xpad_ref[H + 1:H + 2, :, :] = zrow
    xpad_ref[1:H + 1, 0:1, :] = zcol
    xpad_ref[1:H + 1, W + 1:W + 2, :] = zcol
    # Input cast to fp32 happens exactly once, at the scratch write.
    xpad_ref[1:H + 1, 1:W + 1, :] = x_ref[0].astype(jnp.float32)

    # Three width-shifted strips (one aligned, two at static sublane offsets 1/2)
    # instead of 9 misaligned whole-tile tap reads.
    # TODO(synk): the two misaligned strips could alternatively be produced with
    #             pltpu.roll on the sublane axis to push the shift onto the XLU.
    col0 = xpad_ref[:, 0:W, :]          # x[h', w-1]
    col1 = xpad_ref[:, 1:W + 1, :]      # x[h', w  ]
    col2 = xpad_ref[:, 2:W + 2, :]      # x[h', w+1]

    # Per-kernel-row weighted sums in fp32 (bias folded into the centre row).
    r0 = col0 * w[0, 0, :] + col1 * w[0, 1, :] + col2 * w[0, 2, :]
    r1 = col0 * w[1, 0, :] + col1 * w[1, 1, :] + col2 * w[1, 2, :] + b
    r2 = col0 * w[2, 0, :] + col1 * w[2, 1, :] + col2 * w[2, 2, :]

    # Combine the three row-shifted sums; leading-dim slices are cheap (no
    # lane/sublane relayout).  Single lane-dense store to the output.
    out = r0[0:H] + r1[1:H + 1] + r2[2:H + 2]
    o_ref[0] = out.astype(o_ref.dtype)


def _pick_channel_tile(C):
    # Lane-dense channel tile: a multiple of 128, 256 preferred (fits v7x's 64 MiB
    # VMEM with double buffering and gives several parallel grid steps for C=768).
    for ct in (256, 384, 512, 128):
        if C % ct == 0:
            return ct
    return C  # small / odd channel counts: use the full dim (still a legal block)


def dwconv_pallas(x_nchw, weight, bias):
    """Depthwise 3x3 conv, stride 1, padding 1 (forward of PyTorch DWConv).

    x_nchw : (N, C, H, W)
    weight : (C, 1, 3, 3)   PyTorch depthwise layout
    bias   : (C,)
    returns: (N, C, H, W)
    """
    N, C, H, W = x_nchw.shape
    x_nhwc = jnp.transpose(x_nchw, (0, 2, 3, 1))           # channels -> lanes
    w_hwc = jnp.transpose(weight[:, 0, :, :], (1, 2, 0))   # (3, 3, C)
    b_2d = bias.reshape(1, C)

    ct = _pick_channel_tile(C)
    grid = (N, C // ct)
    # TODO(synk): for very large H*W add a row-strip grid axis with halo handling;
    #             at dim=768 the spatial maps are small so (N, C-tiles) suffices.

    out_nhwc = pl.pallas_call(
        dwconv_kernel,
        out_shape=jax.ShapeDtypeStruct((N, H, W, C), x_nchw.dtype),
        grid_spec=pltpu.PrefetchScalarGridSpec(
            num_scalar_prefetch=0,
            grid=grid,
            in_specs=[
                pl.BlockSpec((1, H, W, ct), lambda n, c: (n, 0, 0, c)),
                pl.BlockSpec((3, 3, ct), lambda n, c: (0, 0, c)),
                pl.BlockSpec((1, ct), lambda n, c: (0, c)),
            ],
            out_specs=pl.BlockSpec((1, H, W, ct), lambda n, c: (n, 0, 0, c)),
            scratch_shapes=[pltpu.VMEM((H + 2, W + 2, ct), jnp.float32)],
        ),
        compiler_params=pltpu.CompilerParams(
            # Both grid axes are independent -> shardable across v7x's 2 TensorCores.
            dimension_semantics=("parallel", "parallel"),
            # Above the 16 MiB (v5e) / 32 MiB (v6e, v7x) scoped defaults, below
            # v7x's 64 MiB physical VMEM.
            vmem_limit_bytes=48 * 1024 * 1024,
        ),
    )(x_nhwc, w_hwc, b_2d)

    return jnp.transpose(out_nhwc, (0, 3, 1, 2))


def dwconv_reference(x_nchw, weight, bias):
    # Pure-JAX reference (lax depthwise conv) for correctness checking.
    C = x_nchw.shape[1]
    out = jax.lax.conv_general_dilated(
        x_nchw, weight,
        window_strides=(1, 1),
        padding=((1, 1), (1, 1)),
        feature_group_count=C,
        dimension_numbers=("NCHW", "OIHW", "NCHW"),
        precision=jax.lax.Precision.HIGHEST,
    )
    return out + bias.reshape(1, C, 1, 1)


if __name__ == "__main__":
    key = jax.random.PRNGKey(0)
    kx, kw, kb = jax.random.split(key, 3)

    # Small demo shapes (production dim=768 tiles to Ct=256 channel blocks).
    N, C, H, W = 2, 4, 16, 16
    x = jax.random.normal(kx, (N, C, H, W), dtype=jnp.float32)
    weight = jax.random.normal(kw, (C, 1, 3, 3), dtype=jnp.float32) * 0.1
    bias = jax.random.normal(kb, (C,), dtype=jnp.float32) * 0.1

    out = dwconv_pallas(x, weight, bias)
    out = jax.block_until_ready(out)

    ref = dwconv_reference(x, weight, bias)
    assert out.shape == (N, C, H, W)
    assert jnp.allclose(out, ref, atol=1e-5, rtol=1e-5), "mismatch vs reference"

    print("KERNEL_OK")
</pallas_src>

<mosaic_0001>
module attributes {stable_mosaic.version = 11 : i64} {
  func.func @dwconv_kernel(%arg0: i32, %arg1: i32, %arg2: memref<1x16x16x4xf32, #tpu.memory_space<vmem>>, %arg3: memref<3x3x4xf32, #tpu.memory_space<vmem>>, %arg4: memref<1x4xf32, #tpu.memory_space<vmem>>, %arg5: memref<1x16x16x4xf32, #tpu.memory_space<vmem>>, %arg6: memref<18x18x4xf32, #tpu.memory_space<vmem>>) attributes {dimension_semantics = [#tpu.dimension_semantics<parallel>, #tpu.dimension_semantics<parallel>], iteration_bounds = array<i64: 2, 1>, scalar_prefetch = 0 : i64, scratch_operands = 1 : i64, tpu.core_type = #tpu.core_type<tc>, window_params = [{transform_indices = @transform_0, window_bounds = array<i64: 1, 16, 16, 4>}, {transform_indices = @transform_1, window_bounds = array<i64: 3, 3, 4>}, {transform_indices = @transform_2, window_bounds = array<i64: 1, 4>}, {transform_indices = @transform_3, window_bounds = array<i64: 1, 16, 16, 4>}]} {
    %c0 = arith.constant 0 : index
    %c0_0 = arith.constant 0 : index
    %c0_1 = arith.constant 0 : index
    %0 = vector.load %arg3[%c0, %c0_0, %c0_1] : memref<3x3x4xf32, #tpu.memory_space<vmem>>, vector<3x3x4xf32>
    %c0_2 = arith.constant 0 : index
    %c0_3 = arith.constant 0 : index
    %1 = vector.load %arg4[%c0_2, %c0_3] : memref<1x4xf32, #tpu.memory_space<vmem>>, vector<1x4xf32>
    %cst = arith.constant 0.000000e+00 : f32
    %2 = vector.broadcast %cst : f32 to vector<1x18x4xf32>
    %cst_4 = arith.constant 0.000000e+00 : f32
    %3 = vector.broadcast %cst_4 : f32 to vector<16x1x4xf32>
    %c0_5 = arith.constant 0 : index
    %c0_6 = arith.constant 0 : index
    %c0_7 = arith.constant 0 : index
    %4 = vector.load %arg6[%c0_5, %c0_6, %c0_7] : memref<18x18x4xf32, #tpu.memory_space<vmem>>, vector<1x18x4xf32>
    tpu.vector_store %arg6[%c0_5, %c0_6, %c0_7], %2 {strides = array<i32>} : memref<18x18x4xf32, #tpu.memory_space<vmem>>, vector<1x18x4xf32>,
    %c17 = arith.constant 17 : index
    %c0_8 = arith.constant 0 : index
    %c0_9 = arith.constant 0 : index
    %5 = vector.load %arg6[%c17, %c0_8, %c0_9] : memref<18x18x4xf32, #tpu.memory_space<vmem>>, vector<1x18x4xf32>
    tpu.vector_store %arg6[%c17, %c0_8, %c0_9], %2 {strides = array<i32>} : memref<18x18x4xf32, #tpu.memory_space<vmem>>, vector<1x18x4xf32>,
    %c1 = arith.constant 1 : index
    %c0_10 = arith.constant 0 : index
    %c0_11 = arith.constant 0 : index
    %6 = vector.load %arg6[%c1, %c0_10, %c0_11] : memref<18x18x4xf32, #tpu.memory_space<vmem>>, vector<16x1x4xf32>
    tpu.vector_store %arg6[%c1, %c0_10, %c0_11], %3 {strides = array<i32>} : memref<18x18x4xf32, #tpu.memory_space<vmem>>, vector<16x1x4xf32>,
    %c1_12 = arith.constant 1 : index
    %c17_13 = arith.constant 17 : index
    %c0_14 = arith.constant 0 : index
    %7 = vector.load %arg6[%c1_12, %c17_13, %c0_14] : memref<18x18x4xf32, #tpu.memory_space<vmem>>, vector<16x1x4xf32>
    tpu.vector_store %arg6[%c1_12, %c17_13, %c0_14], %3 {strides = array<i32>} : memref<18x18x4xf32, #tpu.memory_space<vmem>>, vector<16x1x4xf32>,
    %c0_15 = arith.constant 0 : index
    %c0_16 = arith.constant 0 : index
    %c0_17 = arith.constant 0 : index
    %c0_18 = arith.constant 0 : index
    %8 = vector.load %arg2[%c0_15, %c0_16, %c0_17, %c0_18] : memref<1x16x16x4xf32, #tpu.memory_space<vmem>>, vector<1x16x16x4xf32>
    %9 = vector.shape_cast %8 : vector<1x16x16x4xf32> to vector<16x16x4xf32>
    %c1_19 = arith.constant 1 : index
    %c1_20 = arith.constant 1 : index
    %c0_21 = arith.constant 0 : index
    %10 = vector.load %arg6[%c1_19, %c1_20, %c0_21] : memref<18x18x4xf32, #tpu.memory_space<vmem>>, vector<16x16x4xf32>
    tpu.vector_store %arg6[%c1_19, %c1_20, %c0_21], %9 {strides = array<i32>} : memref<18x18x4xf32, #tpu.memory_space<vmem>>, vector<16x16x4xf32>,
    %c0_22 = arith.constant 0 : index
    %c0_23 = arith.constant 0 : index
    %c0_24 = arith.constant 0 : index
    %11 = vector.load %arg6[%c0_22, %c0_23, %c0_24] : memref<18x18x4xf32, #tpu.memory_space<vmem>>, vector<18x16x4xf32>
    %c0_25 = arith.constant 0 : index
    %c1_26 = arith.constant 1 : index
    %c0_27 = arith.constant 0 : index
    %12 = vector.load %arg6[%c0_25, %c1_26, %c0_27] : memref<18x18x4xf32, #tpu.memory_space<vmem>>, vector<18x16x4xf32>
    %c0_28 = arith.constant 0 : index
    %c2 = arith.constant 2 : index
    %c0_29 = arith.constant 0 : index
    %13 = vector.load %arg6[%c0_28, %c2, %c0_29] : memref<18x18x4xf32, #tpu.memory_space<vmem>>, vector<18x16x4xf32>
    %14 = vector.extract_strided_slice %0 {offsets = [0, 0, 0], sizes = [1, 1, 4], strides = [1, 1, 1]} : vector<3x3x4xf32> to vector<1x1x4xf32>
    %15 = vector.shape_cast %14 : vector<1x1x4xf32> to vector<4xf32>
    %16 = vector.shape_cast %15 : vector<4xf32> to vector<1x1x4xf32>
    %17 = vector.broadcast %16 : vector<1x1x4xf32> to vector<18x16x4xf32>
    %18 = arith.mulf %11, %17 : vector<18x16x4xf32>
    %19 = vector.extract_strided_slice %0 {offsets = [0, 1, 0], sizes = [1, 1, 4], strides = [1, 1, 1]} : vector<3x3x4xf32> to vector<1x1x4xf32>
    %20 = vector.shape_cast %19 : vector<1x1x4xf32> to vector<4xf32>
    %21 = vector.shape_cast %20 : vector<4xf32> to vector<1x1x4xf32>
    %22 = vector.broadcast %21 : vector<1x1x4xf32> to vector<18x16x4xf32>
    %23 = arith.mulf %12, %22 : vector<18x16x4xf32>
    %24 = arith.addf %18, %23 : vector<18x16x4xf32>
    %25 = vector.extract_strided_slice %0 {offsets = [0, 2, 0], sizes = [1, 1, 4], strides = [1, 1, 1]} : vector<3x3x4xf32> to vector<1x1x4xf32>
    %26 = vector.shape_cast %25 : vector<1x1x4xf32> to vector<4xf32>
    %27 = vector.shape_cast %26 : vector<4xf32> to vector<1x1x4xf32>
    %28 = vector.broadcast %27 : vector<1x1x4xf32> to vector<18x16x4xf32>
    %29 = arith.mulf %13, %28 : vector<18x16x4xf32>
    %30 = arith.addf %24, %29 : vector<18x16x4xf32>
    %31 = vector.extract_strided_slice %0 {offsets = [1, 0, 0], sizes = [1, 1, 4], strides = [1, 1, 1]} : vector<3x3x4xf32> to vector<1x1x4xf32>
    %32 = vector.shape_cast %31 : vector<1x1x4xf32> to vector<4xf32>
    %33 = vector.shape_cast %32 : vector<4xf32> to vector<1x1x4xf32>
    %34 = vector.broadcast %33 : vector<1x1x4xf32> to vector<18x16x4xf32>
    %35 = arith.mulf %11, %34 : vector<18x16x4xf32>
    %36 = vector.extract_strided_slice %0 {offsets = [1, 1, 0], sizes = [1, 1, 4], strides = [1, 1, 1]} : vector<3x3x4xf32> to vector<1x1x4xf32>
    %37 = vector.shape_cast %36 : vector<1x1x4xf32> to vector<4xf32>
    %38 = vector.shape_cast %37 : vector<4xf32> to vector<1x1x4xf32>
    %39 = vector.broadcast %38 : vector<1x1x4xf32> to vector<18x16x4xf32>
    %40 = arith.mulf %12, %39 : vector<18x16x4xf32>
    %41 = arith.addf %35, %40 : vector<18x16x4xf32>
    %42 = vector.extract_strided_slice %0 {offsets = [1, 2, 0], sizes = [1, 1, 4], strides = [1, 1, 1]} : vector<3x3x4xf32> to vector<1x1x4xf32>
    %43 = vector.shape_cast %42 : vector<1x1x4xf32> to vector<4xf32>
    %44 = vector.shape_cast %43 : vector<4xf32> to vector<1x1x4xf32>
    %45 = vector.broadcast %44 : vector<1x1x4xf32> to vector<18x16x4xf32>
    %46 = arith.mulf %13, %45 : vector<18x16x4xf32>
    %47 = arith.addf %41, %46 : vector<18x16x4xf32>
    %48 = vector.shape_cast %1 : vector<1x4xf32> to vector<1x1x4xf32>
    %49 = vector.broadcast %48 : vector<1x1x4xf32> to vector<18x16x4xf32>
    %50 = arith.addf %47, %49 : vector<18x16x4xf32>
    %51 = vector.extract_strided_slice %0 {offsets = [2, 0, 0], sizes = [1, 1, 4], strides = [1, 1, 1]} : vector<3x3x4xf32> to vector<1x1x4xf32>
    %52 = vector.shape_cast %51 : vector<1x1x4xf32> to vector<4xf32>
    %53 = vector.shape_cast %52 : vector<4xf32> to vector<1x1x4xf32>
    %54 = vector.broadcast %53 : vector<1x1x4xf32> to vector<18x16x4xf32>
    %55 = arith.mulf %11, %54 : vector<18x16x4xf32>
    %56 = vector.extract_strided_slice %0 {offsets = [2, 1, 0], sizes = [1, 1, 4], strides = [1, 1, 1]} : vector<3x3x4xf32> to vector<1x1x4xf32>
    %57 = vector.shape_cast %56 : vector<1x1x4xf32> to vector<4xf32>
    %58 = vector.shape_cast %57 : vector<4xf32> to vector<1x1x4xf32>
    %59 = vector.broadcast %58 : vector<1x1x4xf32> to vector<18x16x4xf32>
    %60 = arith.mulf %12, %59 : vector<18x16x4xf32>
    %61 = arith.addf %55, %60 : vector<18x16x4xf32>
    %62 = vector.extract_strided_slice %0 {offsets = [2, 2, 0], sizes = [1, 1, 4], strides = [1, 1, 1]} : vector<3x3x4xf32> to vector<1x1x4xf32>
    %63 = vector.shape_cast %62 : vector<1x1x4xf32> to vector<4xf32>
    %64 = vector.shape_cast %63 : vector<4xf32> to vector<1x1x4xf32>
    %65 = vector.broadcast %64 : vector<1x1x4xf32> to vector<18x16x4xf32>
    %66 = arith.mulf %13, %65 : vector<18x16x4xf32>
    %67 = arith.addf %61, %66 : vector<18x16x4xf32>
    %68 = vector.extract_strided_slice %30 {offsets = [0, 0, 0], sizes = [16, 16, 4], strides = [1, 1, 1]} : vector<18x16x4xf32> to vector<16x16x4xf32>
    %69 = vector.extract_strided_slice %50 {offsets = [1, 0, 0], sizes = [16, 16, 4], strides = [1, 1, 1]} : vector<18x16x4xf32> to vector<16x16x4xf32>
    %70 = arith.addf %68, %69 : vector<16x16x4xf32>
    %71 = vector.extract_strided_slice %67 {offsets = [2, 0, 0], sizes = [16, 16, 4], strides = [1, 1, 1]} : vector<18x16x4xf32> to vector<16x16x4xf32>
    %72 = arith.addf %70, %71 : vector<16x16x4xf32>
    %c0_30 = arith.constant 0 : index
    %c0_31 = arith.constant 0 : index
    %c0_32 = arith.constant 0 : index
    %c0_33 = arith.constant 0 : index
    %73 = vector.load %arg5[%c0_30, %c0_31, %c0_32, %c0_33] : memref<1x16x16x4xf32, #tpu.memory_space<vmem>>, vector<1x16x16x4xf32>
    %74 = vector.shape_cast %73 : vector<1x16x16x4xf32> to vector<16x16x4xf32>
    %75 = vector.shape_cast %72 : vector<16x16x4xf32> to vector<1x16x16x4xf32>
    tpu.vector_store %arg5[%c0_30, %c0_31, %c0_32, %c0_33], %75 {strides = array<i32>} : memref<1x16x16x4xf32, #tpu.memory_space<vmem>>, vector<1x16x16x4xf32>,
    return
  }
  func.func @transform_0(%arg0: i32, %arg1: i32) -> (i32, i32, i32, i32) {
    %c0_i32 = arith.constant 0 : i32
    %c0_i32_0 = arith.constant 0 : i32
    %c0_i32_1 = arith.constant 0 : i32
    return %arg0, %c0_i32, %c0_i32_0, %arg1 : i32, i32, i32, i32
  }
  func.func @transform_1(%arg0: i32, %arg1: i32) -> (i32, i32, i32) {
    %c0_i32 = arith.constant 0 : i32
    %c0_i32_0 = arith.constant 0 : i32
    %c0_i32_1 = arith.constant 0 : i32
    return %c0_i32, %c0_i32_0, %arg1 : i32, i32, i32
  }
  func.func @transform_2(%arg0: i32, %arg1: i32) -> (i32, i32) {
    %c0_i32 = arith.constant 0 : i32
    %c0_i32_0 = arith.constant 0 : i32
    return %c0_i32, %arg1 : i32, i32
  }
  func.func @transform_3(%arg0: i32, %arg1: i32) -> (i32, i32, i32, i32) {
    %c0_i32 = arith.constant 0 : i32
    %c0_i32_0 = arith.constant 0 : i32
    %c0_i32_1 = arith.constant 0 : i32
    return %arg0, %c0_i32, %c0_i32_0, %arg1 : i32, i32, i32, i32
  }
}

</mosaic_0001>

<bundles_post_ra>
// kernel: tpu_custom_call.1
= control target key start
LH: loop header
LB: loop body
LE: loop exit
PB: predicated region body
PF: predicated region fallthrough
CT: control target
= control target key end

     0   :  { %s1300_s12 = smov 0   ;;  %s1302_s13 = smov 0   ;;  %s2296_s0 = inlined_call_operand.vmem [shape: f32[2,16,16,4], index: 0, kind: input, shape index: {}]   ;;  %s2297_s1 = inlined_call_operand.vmem [shape: f32[3,3,4], index: 1, kind: input, shape index: {}]   ;;  %s2298_s2 = inlined_call_operand.vmem [shape: f32[1,4], index: 2, kind: input, shape index: {}]   ;;  %s2299_s3 = inlined_call_operand.vmem [shape: f32[2,16,16,4], index: 3, kind: output, shape index: {}]  }
   0x1   :  { %s1304_s14 = smov 0  }
   0x2 LB: > { %s25_s15 = sadd.s32 1, %s1273_s13  ;;  %p1219_p0 = scmp.ge.s32.totalorder %s1277_s14, 1  ;;  %s1277_s14 = sphi %s1304_s14, %s13_s14   ;;  %s1273_s13 = sphi %s1302_s13, %s2301_s13   ;;  %s1269_s12 = sphi %s1300_s12, %s2300_s12  }
   0x3   : > { %p27_p1 = scmp.ge.s32.totalorder %s25_s15, 2  ;;  %p173_p2 = scmp.lt.s32.totalorder %s1277_s14, 3 }
   0x5   : > { %s2303_s15 = smov (%p27_p1, %s25_s15), 0  ;;  %p174_p3 = pnand %p1219_p0, %p173_p2 }
   0x6   : > { %p210_p4 = scmp.lt.s32.totalorder (!%p174_p3), %s1269_s12, 1 }
   0x7   : > { %177 = sbr.rel (%p174_p3) target bundleno = 191 (0xbf), region = 32 }
   0xc   : > { %vm237_vm0 = vcmask 31744   ;;  %vm240_vm1 = vcmask 25600   ;;  %vm247_vm2 = vcmask 24576   ;;  %v1279_v0 = vmov 0.0   ;;  %s2305_s12 = smov (!%p210_p4, %s1269_s12), 1 }
   0xd   : > { %238 = vst.msk [vmem:[#allocation2] sm:$0xff] %vm237_vm0, %v1279_v0  ;;  %239 = vst.msk [vmem:[#allocation2 + $0x8] sm:$0xff] %vm237_vm0, %v1279_v0  ;;  %v452_v1 = vlaneseq  ;;  %s1227_s16 = sshll.u32 %s2305_s12, 8  ;;  %v1388_v12 = vld [vmem:[%s2297_s1] sm:$0x7] }
   0xe   : > { %243 = vst.msk [vmem:[#allocation2 + $0x198] sm:$0xff] %vm237_vm0, %v1279_v0  ;;  %244 = vst.msk [vmem:[#allocation2 + $0x1a0] sm:$0xff] %vm237_vm0, %v1279_v0  ;;  %s1368_s19 = scalar_lea.vmem %s2296_s0, %s1227_s16  ;;  %v234_v16 = vld [vmem:[%s2297_s1 + $0x4] sm:$0x7]  ;;  %v235_v17 = vld [vmem:[%s2297_s1 + $0x8] sm:$0x7]  ;;  %s1532_s30 = scalar_lea.vmem %s2299_s3, %s1227_s16 }
   0xf   : > { %241 = vst.msk [vmem:[#allocation2 + $0x10] sm:$0x3] %vm240_vm1, %v1279_v0  ;;  %245 = vst.msk [vmem:[#allocation2 + $0x1a8] sm:$0x3] %vm240_vm1, %v1279_v0  ;;  %v453_v2 = vshrl.u32 %v452_v1, 7  ;;  %v280_v3 = vld [vmem:[%s1368_s19] sm:$0xff] }
  0x10   : > { %248 = vst.msk [vmem:[#allocation2 + $0x18] sm:$0x1] %vm247_vm2, %v1279_v0  ;;  %249 = vst.msk [vmem:[#allocation2 + $0x30] sm:$0x1] %vm247_vm2, %v1279_v0  ;;  %v281_v4 = vld [vmem:[%s1368_s19 + $0x8] sm:$0xff]  ;;  %v282_v5 = vld [vmem:[%s1368_s19 + $0x10] sm:$0xff] }
  0x11   : > { %250 = vst.msk [vmem:[#allocation2 + $0x48] sm:$0x1] %vm247_vm2, %v1279_v0  ;;  %251 = vst.msk [vmem:[#allocation2 + $0x60] sm:$0x1] %vm247_vm2, %v1279_v0  ;;  %v283_v6 = vld [vmem:[%s1368_s19 + $0x18] sm:$0xff]  ;;  %v284_v7 = vld [vmem:[%s1368_s19 + $0x20] sm:$0xff] }
  0x12   : > { %252 = vst.msk [vmem:[#allocation2 + $0x78] sm:$0x1] %vm247_vm2, %v1279_v0  ;;  %253 = vst.msk [vmem:[#allocation2 + $0x90] sm:$0x1] %vm247_vm2, %v1279_v0  ;;  %v285_v8 = vld [vmem:[%s1368_s19 + $0x28] sm:$0xff]  ;;  %v286_v9 = vld [vmem:[%s1368_s19 + $0x30] sm:$0xff] }
  0x13   : > { %254 = vst.msk [vmem:[#allocation2 + $0xa8] sm:$0x1] %vm247_vm2, %v1279_v0  ;;  %255 = vst.msk [vmem:[#allocation2 + $0xc0] sm:$0x1] %vm247_vm2, %v1279_v0  ;;  %v287_v10 = vld [vmem:[%s1368_s19 + $0x38] sm:$0xff]  ;;  %v288_v11 = vld [vmem:[%s1368_s19 + $0x40] sm:$0xff] }
  0x14   : > { %256 = vst.msk [vmem:[#allocation2 + $0xd8] sm:$0x1] %vm247_vm2, %v1279_v0  ;;  %257 = vst.msk [vmem:[#allocation2 + $0xf0] sm:$0x1] %vm247_vm2, %v1279_v0  ;;  %v289_v13 = vld [vmem:[%s1368_s19 + $0x48] sm:$0xff]  ;;  %v290_v14 = vld [vmem:[%s1368_s19 + $0x50] sm:$0xff] }
  0x15   : > { %258 = vst.msk [vmem:[#allocation2 + $0x108] sm:$0x1] %vm247_vm2, %v1279_v0  ;;  %259 = vst.msk [vmem:[#allocation2 + $0x120] sm:$0x1] %vm247_vm2, %v1279_v0  ;;  %v291_v15 = vld [vmem:[%s1368_s19 + $0x58] sm:$0xff]  ;;  %v454_v18 = vsub.s32 0, %v453_v2 }
  0x16   : > { %260 = vst.msk [vmem:[#allocation2 + $0x138] sm:$0x1] %vm247_vm2, %v1279_v0  ;;  %261 = vst.msk [vmem:[#allocation2 + $0x150] sm:$0x1] %vm247_vm2, %v1279_v0  ;;  %v292_v19 = vld [vmem:[%s1368_s19 + $0x60] sm:$0xff]  ;;  %v293_v20 = vld [vmem:[%s1368_s19 + $0x68] sm:$0xff] }
  0x17   : > { %262 = vst.msk [vmem:[#allocation2 + $0x168] sm:$0x1] %vm247_vm2, %v1279_v0  ;;  %263 = vst.msk [vmem:[#allocation2 + $0x180] sm:$0x1] %vm247_vm2, %v1279_v0  ;;  %v294_v21 = vld [vmem:[%s1368_s19 + $0x70] sm:$0xff]  ;;  %v490_v22 = vsub.s32 1, %v453_v2  ;;  %v1427_v33 = vrot.slane %v1388_v12, %v454_v18  ;;  %v1438_v38 = vrot.slane %v234_v16, %v454_v18  ;;  %v1440_v39 = vrot.slane %v235_v17, %v454_v18 }
  0x18   : > { %264 = vst.msk [vmem:[#allocation2 + $0x29] sm:$0x1] %vm247_vm2, %v1279_v0  ;;  %265 = vst.msk [vmem:[#allocation2 + $0x41] sm:$0x1] %vm247_vm2, %v1279_v0  ;;  %v295_v23 = vld [vmem:[%s1368_s19 + $0x78] sm:$0xff]  ;;  %v296_v24 = vld [vmem:[%s1368_s19 + $0x80] sm:$0xff] }
  0x19   : > { %266 = vst.msk [vmem:[#allocation2 + $0x59] sm:$0x1] %vm247_vm2, %v1279_v0  ;;  %267 = vst.msk [vmem:[#allocation2 + $0x71] sm:$0x1] %vm247_vm2, %v1279_v0  ;;  %v297_v25 = vld [vmem:[%s1368_s19 + $0x88] sm:$0xff]  ;;  %v298_v26 = vld [vmem:[%s1368_s19 + $0x90] sm:$0xff]  ;;  %v1436_v37 = vrot.slane %v1388_v12, %v490_v22  ;;  %v1448_v43 = vrot.slane %v234_v16, %v490_v22  ;;  %v1450_v44 = vrot.slane %v235_v17, %v490_v22 }
  0x1a   : > { %268 = vst.msk [vmem:[#allocation2 + $0x89] sm:$0x1] %vm247_vm2, %v1279_v0  ;;  %269 = vst.msk [vmem:[#allocation2 + $0xa1] sm:$0x1] %vm247_vm2, %v1279_v0  ;;  %v299_v27 = vld [vmem:[%s1368_s19 + $0x98] sm:$0xff]  ;;  %v300_v28 = vld [vmem:[%s1368_s19 + $0xa0] sm:$0xff] }
  0x1b   : > { %270 = vst.msk [vmem:[#allocation2 + $0xb9] sm:$0x1] %vm247_vm2, %v1279_v0  ;;  %271 = vst.msk [vmem:[#allocation2 + $0xd1] sm:$0x1] %vm247_vm2, %v1279_v0  ;;  %v558_v29 = vsub.s32 2, %v453_v2  ;;  %v301_v30 = vld [vmem:[%s1368_s19 + $0xa8] sm:$0xff] }
  0x1c   : > { %272 = vst.msk [vmem:[#allocation2 + $0xe9] sm:$0x1] %vm247_vm2, %v1279_v0  ;;  %273 = vst.msk [vmem:[#allocation2 + $0x101] sm:$0x1] %vm247_vm2, %v1279_v0  ;;  %v302_v31 = vld [vmem:[%s1368_s19 + $0xb0] sm:$0xff]  ;;  %v303_v32 = vld [vmem:[%s1368_s19 + $0xb8] sm:$0xff] }
  0x1d   : > { %274 = vst.msk [vmem:[#allocation2 + $0x119] sm:$0x1] %vm247_vm2, %v1279_v0  ;;  %275 = vst.msk [vmem:[#allocation2 + $0x131] sm:$0x1] %vm247_vm2, %v1279_v0  ;;  %v304_v34 = vld [vmem:[%s1368_s19 + $0xc0] sm:$0xff]  ;;  %v305_v35 = vld [vmem:[%s1368_s19 + $0xc8] sm:$0xff]  ;;  %v1457_v48 = vrot.slane %v234_v16, %v558_v29  ;;  %v1459_v49 = vrot.slane %v235_v17, %v558_v29  ;;  %v1467_v54 = vrot.slane %v1388_v12, %v558_v29 }
  0x1e   : > { %276 = vst.msk [vmem:[#allocation2 + $0x149] sm:$0x1] %vm247_vm2, %v1279_v0  ;;  %277 = vst.msk [vmem:[#allocation2 + $0x161] sm:$0x1] %vm247_vm2, %v1279_v0  ;;  %v306_v36 = vld [vmem:[%s1368_s19 + $0xd0] sm:$0xff]  ;;  %v307_v40 = vld [vmem:[%s1368_s19 + $0xd8] sm:$0xff] }
  0x1f   : > { %278 = vst.msk [vmem:[#allocation2 + $0x179] sm:$0x1] %vm247_vm2, %v1279_v0  ;;  %279 = vst.msk [vmem:[#allocation2 + $0x191] sm:$0x1] %vm247_vm2, %v1279_v0  ;;  %v308_v41 = vld [vmem:[%s1368_s19 + $0xe0] sm:$0xff]  ;;  %v309_v42 = vld [vmem:[%s1368_s19 + $0xe8] sm:$0xff] }
  0x20   : > { %312 = vst.msk [vmem:[#allocation2 + $0x19] sm:$0xff] %vm237_vm0, %v280_v3  ;;  %313 = vst.msk [vmem:[#allocation2 + $0x21] sm:$0xff] %vm237_vm0, %v281_v4  ;;  %v310_v45 = vld [vmem:[%s1368_s19 + $0xf0] sm:$0xff]  ;;  %v311_v46 = vld [vmem:[%s1368_s19 + $0xf8] sm:$0xff] }
  0x21   : > { %314 = vst.msk [vmem:[#allocation2 + $0x31] sm:$0xff] %vm237_vm0, %v282_v5  ;;  %315 = vst.msk [vmem:[#allocation2 + $0x39] sm:$0xff] %vm237_vm0, %v283_v6  ;;  %v344_v47 = vld [vmem:[#allocation2] sm:$0xff]  ;;  %v345_v3 = vld [vmem:[#allocation2 + $0x8] sm:$0xff] }
  0x22   : > { %316 = vst.msk [vmem:[#allocation2 + $0x49] sm:$0xff] %vm237_vm0, %v284_v7  ;;  %317 = vst.msk [vmem:[#allocation2 + $0x51] sm:$0xff] %vm237_vm0, %v285_v8  ;;  %v380_v52 = vld [vmem:[#allocation2 + $0x1] sm:$0xff]  ;;  %v456_v53 = vmul.f32 %v1427_v33, %v344_v47  ;;  %v417_v16 = vld [vmem:[#allocation2 + $0xa] sm:$0xff] }
  0x23   : > { %318 = vst.msk [vmem:[#allocation2 + $0x61] sm:$0xff] %vm237_vm0, %v286_v9  ;;  %319 = vst.msk [vmem:[#allocation2 + $0x69] sm:$0xff] %vm237_vm0, %v287_v10  ;;  %v416_v57 = vld [vmem:[#allocation2 + $0x2] sm:$0xff]  ;;  %v492_v58 = vmul.f32 %v1436_v37, %v380_v52 }
  0x24   : > { %320 = vst.msk [vmem:[#allocation2 + $0x79] sm:$0xff] %vm237_vm0, %v288_v11  ;;  %321 = vst.msk [vmem:[#allocation2 + $0x81] sm:$0xff] %vm237_vm0, %v289_v13  ;;  %v560_v0 = vmul.f32 %v1467_v54, %v416_v57  ;;  %v381_v10 = vld [vmem:[#allocation2 + $0x9] sm:$0xff]  ;;  %v457_v11 = vmul.f32 %v1427_v33, %v345_v3 }
  0x25   : > { %322 = vst.msk [vmem:[#allocation2 + $0x91] sm:$0xff] %vm237_vm0, %v290_v14  ;;  %323 = vst.msk [vmem:[#allocation2 + $0x99] sm:$0xff] %vm237_vm0, %v291_v15  ;;  %v524_v5 = vadd.f32 %v492_v58, %v456_v53  ;;  %v493_v17 = vmul.f32 %v1436_v37, %v381_v10 }
  0x26   : > { %324 = vst.msk [vmem:[#allocation2 + $0xa9] sm:$0xff] %vm237_vm0, %v292_v19  ;;  %325 = vst.msk [vmem:[#allocation2 + $0xb1] sm:$0xff] %vm237_vm0, %v293_v20  ;;  %v1496_v19 = vld [vmem:[%s2298_s2] ss:$0 sm:$0xff] }
  0x27   : > { %326 = vst.msk [vmem:[#allocation2 + $0xc1] sm:$0xff] %vm237_vm0, %v294_v21  ;;  %327 = vst.msk [vmem:[#allocation2 + $0xc9] sm:$0xff] %vm237_vm0, %v295_v23  ;;  %v346_v50 = vld [vmem:[#allocation2 + $0x18] sm:$0xff]  ;;  %v347_v8 = vld [vmem:[#allocation2 + $0x20] sm:$0xff]  ;;  %v592_v20 = vadd.f32 %v560_v0, %v524_v5  ;;  %v561_v23 = vmul.f32 %v1467_v54, %v417_v16 }
  0x28   : > { %328 = vst.msk [vmem:[#allocation2 + $0xd9] sm:$0xff] %vm237_vm0, %v296_v24  ;;  %329 = vst.msk [vmem:[#allocation2 + $0xe1] sm:$0xff] %vm237_vm0, %v297_v25  ;;  %v1463_v51 = vld [vmem:[#allocation2 + $0x30] sm:$0xff]  ;;  %v382_v55 = vld [vmem:[#allocation2 + $0x19] sm:$0xff]  ;;  %v628_v59 = vmul.f32 %v1438_v38, %v346_v50  ;;  %v458_v61 = vmul.f32 %v1427_v33, %v346_v50  ;;  %v629_v18 = vmul.f32 %v1438_v38, %v347_v8 }
  0x29   : > { %330 = vst.msk [vmem:[#allocation2 + $0xf1] sm:$0xff] %vm237_vm0, %v298_v26  ;;  %331 = vst.msk [vmem:[#allocation2 + $0xf9] sm:$0xff] %vm237_vm0, %v299_v27  ;;  %v1469_v56 = vld [vmem:[#allocation2 + $0x31] sm:$0xff]  ;;  %v838_v60 = vmul.f32 %v1440_v39, %v1463_v51  ;;  %v418_v62 = vld [vmem:[#allocation2 + $0x1a] sm:$0xff]  ;;  %v664_v1 = vmul.f32 %v1448_v43, %v382_v55  ;;  %v494_v4 = vmul.f32 %v1436_v37, %v382_v55 }
  0x2a   : > { %332 = vst.msk [vmem:[#allocation2 + $0x109] sm:$0xff] %vm237_vm0, %v300_v28  ;;  %333 = vst.msk [vmem:[#allocation2 + $0x111] sm:$0xff] %vm237_vm0, %v301_v30  ;;  %v1476_v63 = vld [vmem:[#allocation2 + $0x32] sm:$0xff]  ;;  %v874_v2 = vmul.f32 %v1450_v44, %v1469_v56  ;;  %v732_v6 = vmul.f32 %v1457_v48, %v418_v62  ;;  %v383_v14 = vld [vmem:[#allocation2 + $0x21] sm:$0xff]  ;;  %v525_v28 = vadd.f32 %v493_v17, %v457_v11 }
  0x2b   : > { %334 = vst.msk [vmem:[#allocation2 + $0x121] sm:$0xff] %vm237_vm0, %v302_v31  ;;  %335 = vst.msk [vmem:[#allocation2 + $0x129] sm:$0xff] %vm237_vm0, %v303_v32  ;;  %v942_v7 = vmul.f32 %v1459_v49, %v1476_v63  ;;  %v1486_v9 = vld [vmem:[#allocation2 + $0x38] sm:$0xff]  ;;  %v696_v12 = vadd.f32 %v664_v1, %v628_v59  ;;  %v419_v21 = vld [vmem:[#allocation2 + $0x22] sm:$0xff]  ;;  %v665_v24 = vmul.f32 %v1448_v43, %v383_v14 }
  0x2c   : > { %336 = vst.msk [vmem:[#allocation2 + $0x139] sm:$0xff] %vm237_vm0, %v304_v34  ;;  %337 = vst.msk [vmem:[#allocation2 + $0x141] sm:$0xff] %vm237_vm0, %v305_v35  ;;  %v906_v13 = vadd.f32 %v874_v2, %v838_v60  ;;  %v1489_v15 = vld [vmem:[#allocation2 + $0x39] sm:$0xff]  ;;  %v839_v25 = vmul.f32 %v1440_v39, %v1486_v9  ;;  %v733_v29 = vmul.f32 %v1457_v48, %v419_v21  ;;  %v1509_v34 = vld [vmem:[#allocation2 + $0x48] sm:$0xff] }
  0x2d   : > { %338 = vst.msk [vmem:[#allocation2 + $0x151] sm:$0xff] %vm237_vm0, %v306_v36  ;;  %339 = vst.msk [vmem:[#allocation2 + $0x159] sm:$0xff] %vm237_vm0, %v307_v40  ;;  %v1498_v22 = vld [vmem:[#allocation2 + $0x3a] sm:$0xff]  ;;  %v764_v26 = vadd.f32 %v732_v6, %v696_v12  ;;  %v697_v30 = vadd.f32 %v665_v24, %v629_v18  ;;  %v875_v31 = vmul.f32 %v1450_v44, %v1489_v15  ;;  %v1511_v35 = vld [vmem:[#allocation2 + $0x49] sm:$0xff] }
  0x2e   : > { %340 = vst.msk [vmem:[#allocation2 + $0x169] sm:$0xff] %vm237_vm0, %v308_v41  ;;  %341 = vst.msk [vmem:[#allocation2 + $0x171] sm:$0xff] %vm237_vm0, %v309_v42  ;;  %v974_v27 = vadd.f32 %v942_v7, %v906_v13  ;;  %v943_v32 = vmul.f32 %v1459_v49, %v1498_v22  ;;  %v526_v36 = vadd.f32 %v494_v4, %v458_v61  ;;  %v1514_v42 = vld [vmem:[#allocation2 + $0x4a] sm:$0xff]  ;;  %v1543_v11 = vld [vmem:[#allocation2 + $0x52] sm:$0xff] }
  0x2f   : > { %342 = vst.msk [vmem:[#allocation2 + $0x181] sm:$0xff] %vm237_vm0, %v310_v45  ;;  %343 = vst.msk [vmem:[#allocation2 + $0x189] sm:$0xff] %vm237_vm0, %v311_v46  ;;  %v802_v40 = vadd.f32 %v1496_v19, %v764_v26  ;;  %v593_v41 = vadd.f32 %v561_v23, %v525_v28  ;;  %v562_v45 = vmul.f32 %v1467_v54, %v418_v62  ;;  %v1537_v3 = vld [vmem:[#allocation2 + $0x50] sm:$0xff] }
  0x30   : > { %v630_v46 = vmul.f32 %v1438_v38, %v1463_v51  ;;  %v765_v47 = vadd.f32 %v733_v29, %v697_v30  ;;  %v907_v50 = vadd.f32 %v875_v31, %v839_v25  ;;  %v666_v52 = vmul.f32 %v1448_v43, %v1469_v56  ;;  %v1539_v4 = vld [vmem:[#allocation2 + $0x51] sm:$0xff]  ;;  %v1567_v31 = vld [vmem:[#allocation2 + $0x61] sm:$0xff] }
  0x31   : > { %v734_v53 = vmul.f32 %v1457_v48, %v1476_v63  ;;  %v1006_v55 = vadd.f32 %v802_v40, %v592_v20  ;;  %v594_v57 = vadd.f32 %v562_v45, %v526_v36  ;;  %v840_v58 = vmul.f32 %v1440_v39, %v1509_v34 }
  0x32   : > { %v876_v59 = vmul.f32 %v1450_v44, %v1511_v35  ;;  %v803_v60 = vadd.f32 %v1496_v19, %v765_v47  ;;  %v975_v61 = vadd.f32 %v943_v32, %v907_v50  ;;  %v698_v62 = vadd.f32 %v666_v52, %v630_v46  ;;  %v1569_v32 = vld [vmem:[#allocation2 + $0x62] sm:$0xff] }
  0x33   : > { %v944_v0 = vmul.f32 %v1459_v49, %v1514_v42  ;;  %v1038_v1 = vadd.f32 %v1006_v55, %v974_v27  ;;  %v459_v5 = vmul.f32 %v1427_v33, %v347_v8  ;;  %v495_v6 = vmul.f32 %v1436_v37, %v383_v14  ;;  %v1561_v27 = vld [vmem:[#allocation2 + $0x60] sm:$0xff] }
  0x34   : > { %v908_v2 = vadd.f32 %v876_v59, %v840_v58  ;;  %v1007_v7 = vadd.f32 %v803_v60, %v593_v41  ;;  %v766_v10 = vadd.f32 %v734_v53, %v698_v62  ;;  %v563_v12 = vmul.f32 %v1467_v54, %v419_v21  ;;  %v1588_v58 = vld [vmem:[#allocation2 + $0x68] sm:$0xff] }
  0x35   : > { %v631_v13 = vmul.f32 %v1438_v38, %v1486_v9  ;;  %1070 = vst.msk [vmem:[%s1532_s30] sm:$0xff] %vm237_vm0, %v1038_v1  ;;  %v527_v17 = vadd.f32 %v495_v6, %v459_v5  ;;  %v667_v18 = vmul.f32 %v1448_v43, %v1489_v15  ;;  %v735_v8 = vmul.f32 %v1457_v48, %v1498_v22  ;;  %v1592_v60 = vld [vmem:[#allocation2 + $0x69] sm:$0xff] }
  0x36   : > { %v976_v16 = vadd.f32 %v944_v0, %v908_v2  ;;  %v1039_v14 = vadd.f32 %v1007_v7, %v975_v61  ;;  %v804_v20 = vadd.f32 %v1496_v19, %v766_v10  ;;  %v841_v21 = vmul.f32 %v1440_v39, %v1537_v3  ;;  %v1600_v6 = vld [vmem:[#allocation2 + $0x6a] sm:$0xff] }
  0x37   : > { %v877_v23 = vmul.f32 %v1450_v44, %v1539_v4  ;;  %v595_v24 = vadd.f32 %v563_v12, %v527_v17  ;;  %v699_v25 = vadd.f32 %v667_v18, %v631_v13  ;;  %v945_v26 = vmul.f32 %v1459_v49, %v1543_v11 }
  0x38   : > { %v460_v28 = vmul.f32 %v1427_v33, %v1463_v51  ;;  %1071 = vst.msk [vmem:[%s1532_s30 + $0x8] sm:$0xff] %vm237_vm0, %v1039_v14  ;;  %v1008_v29 = vadd.f32 %v804_v20, %v594_v57  ;;  %v496_v36 = vmul.f32 %v1436_v37, %v1469_v56  ;;  %v564_v40 = vmul.f32 %v1467_v54, %v1476_v63  ;;  %v1615_v20 = vld [vmem:[#allocation2 + $0x78] sm:$0xff] }
  0x39   : > { %v909_v30 = vadd.f32 %v877_v23, %v841_v21  ;;  %v767_v41 = vadd.f32 %v735_v8, %v699_v25  ;;  %v632_v45 = vmul.f32 %v1438_v38, %v1509_v34  ;;  %v668_v51 = vmul.f32 %v1448_v43, %v1511_v35  ;;  %v1621_v25 = vld [vmem:[#allocation2 + $0x79] sm:$0xff] }
  0x3a   : > { %v736_v46 = vmul.f32 %v1457_v48, %v1514_v42  ;;  %v1040_v47 = vadd.f32 %v1008_v29, %v976_v16  ;;  %v528_v52 = vadd.f32 %v496_v36, %v460_v28  ;;  %v842_v53 = vmul.f32 %v1440_v39, %v1561_v27 }
  0x3b   : > { %v977_v50 = vadd.f32 %v945_v26, %v909_v30  ;;  %v805_v56 = vadd.f32 %v1496_v19, %v767_v41  ;;  %v700_v55 = vadd.f32 %v668_v51, %v632_v45  ;;  %v878_v63 = vmul.f32 %v1450_v44, %v1567_v31  ;;  %v1623_v26 = vld [vmem:[#allocation2 + $0x7a] sm:$0xff] }
  0x3c   : > { %v946_v57 = vmul.f32 %v1459_v49, %v1569_v32  ;;  %1072 = vst.msk [vmem:[%s1532_s30 + $0x10] sm:$0xff] %vm237_vm0, %v1040_v47  ;;  %v596_v59 = vadd.f32 %v564_v40, %v528_v52  ;;  %v461_v61 = vmul.f32 %v1427_v33, %v1486_v9  ;;  %v497_v62 = vmul.f32 %v1436_v37, %v1489_v15  ;;  %v1642_v52 = vld [vmem:[#allocation2 + $0x80] sm:$0xff] }
  0x3d   : > { %v565_v0 = vmul.f32 %v1467_v54, %v1498_v22  ;;  %v1009_v1 = vadd.f32 %v805_v56, %v595_v24  ;;  %v768_v2 = vadd.f32 %v736_v46, %v700_v55  ;;  %v910_v5 = vadd.f32 %v878_v63, %v842_v53  ;;  %v1646_v56 = vld [vmem:[#allocation2 + $0x81] sm:$0xff] }
  0x3e   : > { %v633_v7 = vmul.f32 %v1438_v38, %v1537_v3  ;;  %v529_v10 = vadd.f32 %v497_v62, %v461_v61  ;;  %v669_v12 = vmul.f32 %v1448_v43, %v1539_v4  ;;  %v737_v9 = vmul.f32 %v1457_v48, %v1543_v11 }
  0x3f   : > { %v843_v15 = vmul.f32 %v1440_v39, %v1588_v58  ;;  %v1041_v22 = vadd.f32 %v1009_v1, %v977_v50  ;;  %v806_v13 = vadd.f32 %v1496_v19, %v768_v2  ;;  %v978_v16 = vadd.f32 %v946_v57, %v910_v5 }
  0x40   : > { %v879_v17 = vmul.f32 %v1450_v44, %v1592_v60  ;;  %v597_v18 = vadd.f32 %v565_v0, %v529_v10  ;;  %v701_v8 = vadd.f32 %v669_v12, %v633_v7  ;;  %v947_v14 = vmul.f32 %v1459_v49, %v1600_v6  ;;  %v1654_v0 = vld [vmem:[#allocation2 + $0x82] sm:$0xff] }
  0x41   : > { %v462_v21 = vmul.f32 %v1427_v33, %v1509_v34  ;;  %1073 = vst.msk [vmem:[%s1532_s30 + $0x18] sm:$0xff] %vm237_vm0, %v1041_v22  ;;  %v1010_v23 = vadd.f32 %v806_v13, %v596_v59  ;;  %v498_v28 = vmul.f32 %v1436_v37, %v1511_v35  ;;  %v566_v29 = vmul.f32 %v1467_v54, %v1514_v42  ;;  %v1669_v13 = vld [vmem:[#allocation2 + $0x90] sm:$0xff] }
  0x42   : > { %v911_v24 = vadd.f32 %v879_v17, %v843_v15  ;;  %v769_v30 = vadd.f32 %v737_v9, %v701_v8  ;;  %v634_v36 = vmul.f32 %v1438_v38, %v1561_v27  ;;  %v670_v34 = vmul.f32 %v1448_v43, %v1567_v31  ;;  %v1675_v8 = vld [vmem:[#allocation2 + $0x91] sm:$0xff] }
  0x43   : > { %v738_v40 = vmul.f32 %v1457_v48, %v1569_v32  ;;  %v1042_v41 = vadd.f32 %v1010_v23, %v978_v16  ;;  %v530_v51 = vadd.f32 %v498_v28, %v462_v21  ;;  %v844_v46 = vmul.f32 %v1440_v39, %v1615_v20 }
  0x44   : > { %v979_v45 = vadd.f32 %v947_v14, %v911_v24  ;;  %v807_v35 = vadd.f32 %v1496_v19, %v769_v30  ;;  %v702_v47 = vadd.f32 %v670_v34, %v634_v36  ;;  %v880_v42 = vmul.f32 %v1450_v44, %v1621_v25  ;;  %v1677_v14 = vld [vmem:[#allocation2 + $0x92] sm:$0xff] }
  0x45   : > { %v948_v50 = vmul.f32 %v1459_v49, %v1623_v26  ;;  %1074 = vst.msk [vmem:[%s1532_s30 + $0x20] sm:$0xff] %vm237_vm0, %v1042_v41  ;;  %v598_v53 = vadd.f32 %v566_v29, %v530_v51  ;;  %v463_v55 = vmul.f32 %v1427_v33, %v1537_v3  ;;  %v499_v63 = vmul.f32 %v1436_v37, %v1539_v4  ;;  %v1696_v51 = vld [vmem:[#allocation2 + $0x98] sm:$0xff] }
  0x46   : > { %v567_v57 = vmul.f32 %v1467_v54, %v1543_v11  ;;  %v1011_v59 = vadd.f32 %v807_v35, %v597_v18  ;;  %v770_v61 = vadd.f32 %v738_v40, %v702_v47  ;;  %v912_v62 = vadd.f32 %v880_v42, %v844_v46  ;;  %v1700_v35 = vld [vmem:[#allocation2 + $0x99] sm:$0xff] }
  0x47   : > { %v635_v1 = vmul.f32 %v1438_v38, %v1588_v58  ;;  %v531_v2 = vadd.f32 %v499_v63, %v463_v55  ;;  %v671_v5 = vmul.f32 %v1448_v43, %v1592_v60  ;;  %v739_v3 = vmul.f32 %v1457_v48, %v1600_v6 }
  0x48   : > { %v845_v4 = vmul.f32 %v1440_v39, %v1642_v52  ;;  %v1043_v11 = vadd.f32 %v1011_v59, %v979_v45  ;;  %v808_v7 = vadd.f32 %v1496_v19, %v770_v61  ;;  %v980_v10 = vadd.f32 %v948_v50, %v912_v62 }
  0x49   : > { %v881_v12 = vmul.f32 %v1450_v44, %v1646_v56  ;;  %v599_v9 = vadd.f32 %v567_v57, %v531_v2  ;;  %v703_v15 = vadd.f32 %v671_v5, %v635_v1  ;;  %v949_v22 = vmul.f32 %v1459_v49, %v1654_v0  ;;  %v1708_v57 = vld [vmem:[#allocation2 + $0x9a] sm:$0xff] }
  0x4a   : > { %v464_v16 = vmul.f32 %v1427_v33, %v1561_v27  ;;  %1075 = vst.msk [vmem:[%s1532_s30 + $0x28] sm:$0xff] %vm237_vm0, %v1043_v11  ;;  %v1012_v17 = vadd.f32 %v808_v7, %v598_v53  ;;  %v500_v21 = vmul.f32 %v1436_v37, %v1567_v31  ;;  %v568_v23 = vmul.f32 %v1467_v54, %v1569_v32  ;;  %v1723_v7 = vld [vmem:[#allocation2 + $0xa8] sm:$0xff] }
  0x4b   : > { %v913_v18 = vadd.f32 %v881_v12, %v845_v4  ;;  %v771_v24 = vadd.f32 %v739_v3, %v703_v15  ;;  %v636_v28 = vmul.f32 %v1438_v38, %v1615_v20  ;;  %v672_v27 = vmul.f32 %v1448_v43, %v1621_v25  ;;  %v1729_v15 = vld [vmem:[#allocation2 + $0xa9] sm:$0xff] }
  0x4c   : > { %v740_v29 = vmul.f32 %v1457_v48, %v1623_v26  ;;  %v1044_v30 = vadd.f32 %v1012_v17, %v980_v10  ;;  %v532_v34 = vadd.f32 %v500_v21, %v464_v16  ;;  %v846_v40 = vmul.f32 %v1440_v39, %v1669_v13 }
  0x4d   : > { %v981_v36 = vadd.f32 %v949_v22, %v913_v18  ;;  %v809_v31 = vadd.f32 %v1496_v19, %v771_v24  ;;  %v704_v41 = vadd.f32 %v672_v27, %v636_v28  ;;  %v882_v32 = vmul.f32 %v1450_v44, %v1675_v8  ;;  %v1731_v22 = vld [vmem:[#allocation2 + $0xaa] sm:$0xff] }
  0x4e   : > { %v950_v45 = vmul.f32 %v1459_v49, %v1677_v14  ;;  %1076 = vst.msk [vmem:[%s1532_s30 + $0x30] sm:$0xff] %vm237_vm0, %v1044_v30  ;;  %v600_v46 = vadd.f32 %v568_v23, %v532_v34  ;;  %v465_v47 = vmul.f32 %v1427_v33, %v1588_v58  ;;  %v501_v42 = vmul.f32 %v1436_v37, %v1592_v60  ;;  %v1750_v34 = vld [vmem:[#allocation2 + $0xb0] sm:$0xff] }
  0x4f   : > { %v569_v50 = vmul.f32 %v1467_v54, %v1600_v6  ;;  %v1013_v53 = vadd.f32 %v809_v31, %v599_v9  ;;  %v772_v55 = vadd.f32 %v740_v29, %v704_v41  ;;  %v914_v63 = vadd.f32 %v882_v32, %v846_v40  ;;  %v1754_v31 = vld [vmem:[#allocation2 + $0xb1] sm:$0xff] }
  0x50   : > { %v637_v59 = vmul.f32 %v1438_v38, %v1642_v52  ;;  %v533_v61 = vadd.f32 %v501_v42, %v465_v47  ;;  %v673_v62 = vmul.f32 %v1448_v43, %v1646_v56  ;;  %v741_v58 = vmul.f32 %v1457_v48, %v1654_v0 }
  0x51   : > { %v847_v60 = vmul.f32 %v1440_v39, %v1696_v51  ;;  %v1045_v6 = vadd.f32 %v1013_v53, %v981_v36  ;;  %v810_v1 = vadd.f32 %v1496_v19, %v772_v55  ;;  %v982_v2 = vadd.f32 %v950_v45, %v914_v63 }
  0x52   : > { %v883_v5 = vmul.f32 %v1450_v44, %v1700_v35  ;;  %v601_v3 = vadd.f32 %v569_v50, %v533_v61  ;;  %v705_v4 = vadd.f32 %v673_v62, %v637_v59  ;;  %v951_v11 = vmul.f32 %v1459_v49, %v1708_v57  ;;  %v1762_v50 = vld [vmem:[#allocation2 + $0xb2] sm:$0xff] }
  0x53   : > { %v466_v10 = vmul.f32 %v1427_v33, %v1615_v20  ;;  %1077 = vst.msk [vmem:[%s1532_s30 + $0x38] sm:$0xff] %vm237_vm0, %v1045_v6  ;;  %v1014_v12 = vadd.f32 %v810_v1, %v600_v46  ;;  %v502_v16 = vmul.f32 %v1436_v37, %v1621_v25  ;;  %v570_v17 = vmul.f32 %v1467_v54, %v1623_v26  ;;  %v1777_v1 = vld [vmem:[#allocation2 + $0xc0] sm:$0xff] }
  0x54   : > { %v915_v9 = vadd.f32 %v883_v5, %v847_v60  ;;  %v773_v18 = vadd.f32 %v741_v58, %v705_v4  ;;  %v638_v21 = vmul.f32 %v1438_v38, %v1669_v13  ;;  %v674_v20 = vmul.f32 %v1448_v43, %v1675_v8  ;;  %v1783_v4 = vld [vmem:[#allocation2 + $0xc1] sm:$0xff] }
  0x55   : > { %v742_v23 = vmul.f32 %v1457_v48, %v1677_v14  ;;  %v1046_v24 = vadd.f32 %v1014_v12, %v982_v2  ;;  %v534_v27 = vadd.f32 %v502_v16, %v466_v10  ;;  %v848_v29 = vmul.f32 %v1440_v39, %v1723_v7 }
  0x56   : > { %v983_v28 = vadd.f32 %v951_v11, %v915_v9  ;;  %v811_v25 = vadd.f32 %v1496_v19, %v773_v18  ;;  %v706_v30 = vadd.f32 %v674_v20, %v638_v21  ;;  %v884_v26 = vmul.f32 %v1450_v44, %v1729_v15  ;;  %v1785_v11 = vld [vmem:[#allocation2 + $0xc2] sm:$0xff] }
  0x57   : > { %v952_v36 = vmul.f32 %v1459_v49, %v1731_v22  ;;  %1078 = vst.msk [vmem:[%s1532_s30 + $0x40] sm:$0xff] %vm237_vm0, %v1046_v24  ;;  %v602_v40 = vadd.f32 %v570_v17, %v534_v27  ;;  %v467_v41 = vmul.f32 %v1427_v33, %v1642_v52  ;;  %v503_v32 = vmul.f32 %v1436_v37, %v1646_v56  ;;  %v1804_v27 = vld [vmem:[#allocation2 + $0xc8] sm:$0xff] }
  0x58   : > { %v571_v45 = vmul.f32 %v1467_v54, %v1654_v0  ;;  %v1015_v46 = vadd.f32 %v811_v25, %v601_v3  ;;  %v774_v47 = vadd.f32 %v742_v23, %v706_v30  ;;  %v916_v42 = vadd.f32 %v884_v26, %v848_v29  ;;  %v1808_v25 = vld [vmem:[#allocation2 + $0xc9] sm:$0xff] }
  0x59   : > { %v639_v53 = vmul.f32 %v1438_v38, %v1696_v51  ;;  %v535_v55 = vadd.f32 %v503_v32, %v467_v41  ;;  %v675_v63 = vmul.f32 %v1448_v43, %v1700_v35  ;;  %v743_v52 = vmul.f32 %v1457_v48, %v1708_v57 }
  0x5a   : > { %v849_v56 = vmul.f32 %v1440_v39, %v1750_v34  ;;  %v1047_v0 = vadd.f32 %v1015_v46, %v983_v28  ;;  %v812_v59 = vadd.f32 %v1496_v19, %v774_v47  ;;  %v984_v61 = vadd.f32 %v952_v36, %v916_v42 }
  0x5b   : > { %v885_v62 = vmul.f32 %v1450_v44, %v1754_v31  ;;  %v603_v58 = vadd.f32 %v571_v45, %v535_v55  ;;  %v707_v60 = vadd.f32 %v675_v63, %v639_v53  ;;  %v953_v6 = vmul.f32 %v1459_v49, %v1762_v50  ;;  %v1816_v45 = vld [vmem:[#allocation2 + $0xca] sm:$0xff] }
  0x5c   : > { %v468_v2 = vmul.f32 %v1427_v33, %v1669_v13  ;;  %1079 = vst.msk [vmem:[%s1532_s30 + $0x48] sm:$0xff] %vm237_vm0, %v1047_v0  ;;  %v1016_v5 = vadd.f32 %v812_v59, %v602_v40  ;;  %v504_v10 = vmul.f32 %v1436_v37, %v1675_v8  ;;  %v572_v12 = vmul.f32 %v1467_v54, %v1677_v14  ;;  %v1831_v59 = vld [vmem:[#allocation2 + $0xd8] sm:$0xff] }
  0x5d   : > { %v917_v3 = vadd.f32 %v885_v62, %v849_v56  ;;  %v775_v9 = vadd.f32 %v743_v52, %v707_v60  ;;  %v640_v16 = vmul.f32 %v1438_v38, %v1723_v7  ;;  %v676_v13 = vmul.f32 %v1448_v43, %v1729_v15  ;;  %v1837_v60 = vld [vmem:[#allocation2 + $0xd9] sm:$0xff] }
  0x5e   : > { %v744_v17 = vmul.f32 %v1457_v48, %v1731_v22  ;;  %v1048_v18 = vadd.f32 %v1016_v5, %v984_v61  ;;  %v536_v20 = vadd.f32 %v504_v10, %v468_v2  ;;  %v850_v23 = vmul.f32 %v1440_v39, %v1777_v1 }
  0x5f   : > { %v985_v21 = vadd.f32 %v953_v6, %v917_v3  ;;  %v813_v8 = vadd.f32 %v1496_v19, %v775_v9  ;;  %v708_v24 = vadd.f32 %v676_v13, %v640_v16  ;;  %v886_v14 = vmul.f32 %v1450_v44, %v1783_v4  ;;  %v1839_v6 = vld [vmem:[#allocation2 + $0xda] sm:$0xff] }
  0x60   : > { %v954_v28 = vmul.f32 %v1459_v49, %v1785_v11  ;;  %1080 = vst.msk [vmem:[%s1532_s30 + $0x50] sm:$0xff] %vm237_vm0, %v1048_v18  ;;  %v604_v29 = vadd.f32 %v572_v12, %v536_v20  ;;  %v469_v30 = vmul.f32 %v1427_v33, %v1696_v51  ;;  %v505_v26 = vmul.f32 %v1436_v37, %v1700_v35  ;;  %v1858_v20 = vld [vmem:[#allocation2 + $0xe0] sm:$0xff] }
  0x61   : > { %v573_v36 = vmul.f32 %v1467_v54, %v1708_v57  ;;  %v1017_v40 = vadd.f32 %v813_v8, %v603_v58  ;;  %v776_v41 = vadd.f32 %v744_v17, %v708_v24  ;;  %v918_v32 = vadd.f32 %v886_v14, %v850_v23  ;;  %v1862_v8 = vld [vmem:[#allocation2 + $0xe1] sm:$0xff] }
  0x62   : > { %v641_v46 = vmul.f32 %v1438_v38, %v1750_v34  ;;  %v537_v47 = vadd.f32 %v505_v26, %v469_v30  ;;  %v677_v42 = vmul.f32 %v1448_v43, %v1754_v31  ;;  %v745_v51 = vmul.f32 %v1457_v48, %v1762_v50 }
  0x63   : > { %v851_v35 = vmul.f32 %v1440_v39, %v1804_v27  ;;  %v1049_v57 = vadd.f32 %v1017_v40, %v985_v21  ;;  %v814_v53 = vadd.f32 %v1496_v19, %v776_v41  ;;  %v986_v55 = vadd.f32 %v954_v28, %v918_v32 }
  0x64   : > { %v887_v63 = vmul.f32 %v1450_v44, %v1808_v25  ;;  %v605_v52 = vadd.f32 %v573_v36, %v537_v47  ;;  %v709_v56 = vadd.f32 %v677_v42, %v641_v46  ;;  %v955_v0 = vmul.f32 %v1459_v49, %v1816_v45  ;;  %v1870_v36 = vld [vmem:[#allocation2 + $0xe2] sm:$0xff] }
  0x65   : > { %v470_v61 = vmul.f32 %v1427_v33, %v1723_v7  ;;  %1081 = vst.msk [vmem:[%s1532_s30 + $0x58] sm:$0xff] %vm237_vm0, %v1049_v57  ;;  %v1018_v62 = vadd.f32 %v814_v53, %v604_v29  ;;  %v506_v2 = vmul.f32 %v1436_v37, %v1729_v15  ;;  %v574_v5 = vmul.f32 %v1467_v54, %v1731_v22  ;;  %v1885_v53 = vld [vmem:[#allocation2 + $0xf0] sm:$0xff] }
  0x66   : > { %v919_v58 = vadd.f32 %v887_v63, %v851_v35  ;;  %v777_v3 = vadd.f32 %v745_v51, %v709_v56  ;;  %v642_v10 = vmul.f32 %v1438_v38, %v1777_v1  ;;  %v678_v7 = vmul.f32 %v1448_v43, %v1783_v4  ;;  %v1891_v56 = vld [vmem:[#allocation2 + $0xf1] sm:$0xff] }
  0x67   : > { %v746_v12 = vmul.f32 %v1457_v48, %v1785_v11  ;;  %v1050_v9 = vadd.f32 %v1018_v62, %v986_v55  ;;  %v538_v13 = vadd.f32 %v506_v2, %v470_v61  ;;  %v852_v17 = vmul.f32 %v1440_v39, %v1831_v59 }
  0x68   : > { %v987_v16 = vadd.f32 %v955_v0, %v919_v58  ;;  %v815_v15 = vadd.f32 %v1496_v19, %v777_v3  ;;  %v710_v18 = vadd.f32 %v678_v7, %v642_v10  ;;  %v888_v22 = vmul.f32 %v1450_v44, %v1837_v60  ;;  %v1893_v0 = vld [vmem:[#allocation2 + $0xf2] sm:$0xff] }
  0x69   : > { %v956_v21 = vmul.f32 %v1459_v49, %v1839_v6  ;;  %1082 = vst.msk [vmem:[%s1532_s30 + $0x60] sm:$0xff] %vm237_vm0, %v1050_v9  ;;  %v606_v23 = vadd.f32 %v574_v5, %v538_v13  ;;  %v471_v24 = vmul.f32 %v1427_v33, %v1750_v34  ;;  %v507_v14 = vmul.f32 %v1436_v37, %v1754_v31  ;;  %v1912_v13 = vld [vmem:[#allocation2 + $0xf8] sm:$0xff] }
  0x6a   : > { %v575_v28 = vmul.f32 %v1467_v54, %v1762_v50  ;;  %v1019_v29 = vadd.f32 %v815_v15, %v605_v52  ;;  %v778_v30 = vadd.f32 %v746_v12, %v710_v18  ;;  %v920_v26 = vadd.f32 %v888_v22, %v852_v17  ;;  %v1916_v15 = vld [vmem:[#allocation2 + $0xf9] sm:$0xff] }
  0x6b   : > { %v643_v40 = vmul.f32 %v1438_v38, %v1804_v27  ;;  %v539_v41 = vadd.f32 %v507_v14, %v471_v24  ;;  %v679_v32 = vmul.f32 %v1448_v43, %v1808_v25  ;;  %v747_v34 = vmul.f32 %v1457_v48, %v1816_v45 }
  0x6c   : > { %v853_v31 = vmul.f32 %v1440_v39, %v1858_v20  ;;  %v1051_v50 = vadd.f32 %v1019_v29, %v987_v16  ;;  %v816_v46 = vadd.f32 %v1496_v19, %v778_v30  ;;  %v988_v47 = vadd.f32 %v956_v21, %v920_v26 }
  0x6d   : > { %v889_v42 = vmul.f32 %v1450_v44, %v1862_v8  ;;  %v607_v51 = vadd.f32 %v575_v28, %v539_v41  ;;  %v711_v35 = vadd.f32 %v679_v32, %v643_v40  ;;  %v957_v57 = vmul.f32 %v1459_v49, %v1870_v36  ;;  %v1924_v28 = vld [vmem:[#allocation2 + $0xfa] sm:$0xff] }
  0x6e   : > { %v472_v55 = vmul.f32 %v1427_v33, %v1777_v1  ;;  %1083 = vst.msk [vmem:[%s1532_s30 + $0x68] sm:$0xff] %vm237_vm0, %v1051_v50  ;;  %v1020_v63 = vadd.f32 %v816_v46, %v606_v23  ;;  %v508_v61 = vmul.f32 %v1436_v37, %v1783_v4  ;;  %v576_v62 = vmul.f32 %v1467_v54, %v1785_v11  ;;  %v1939_v46 = vld [vmem:[#allocation2 + $0x108] sm:$0xff] }
  0x6f   : > { %v921_v52 = vadd.f32 %v889_v42, %v853_v31  ;;  %v779_v58 = vadd.f32 %v747_v34, %v711_v35  ;;  %v644_v2 = vmul.f32 %v1438_v38, %v1831_v59  ;;  %v680_v1 = vmul.f32 %v1448_v43, %v1837_v60  ;;  %v1945_v35 = vld [vmem:[#allocation2 + $0x109] sm:$0xff] }
  0x70   : > { %v748_v5 = vmul.f32 %v1457_v48, %v1839_v6  ;;  %v1052_v3 = vadd.f32 %v1020_v63, %v988_v47  ;;  %v540_v7 = vadd.f32 %v508_v61, %v472_v55  ;;  %v854_v12 = vmul.f32 %v1440_v39, %v1885_v53 }
  0x71   : > { %v989_v10 = vadd.f32 %v957_v57, %v921_v52  ;;  %v817_v4 = vadd.f32 %v1496_v19, %v779_v58  ;;  %v712_v9 = vadd.f32 %v680_v1, %v644_v2  ;;  %v890_v11 = vmul.f32 %v1450_v44, %v1891_v56  ;;  %v1947_v57 = vld [vmem:[#allocation2 + $0x10a] sm:$0xff] }
  0x72   : > { %v958_v16 = vmul.f32 %v1459_v49, %v1893_v0  ;;  %1084 = vst.msk [vmem:[%s1532_s30 + $0x70] sm:$0xff] %vm237_vm0, %v1052_v3  ;;  %v608_v17 = vadd.f32 %v576_v62, %v540_v7  ;;  %v473_v18 = vmul.f32 %v1427_v33, %v1804_v27  ;;  %v509_v22 = vmul.f32 %v1436_v37, %v1808_v25  ;;  %v1966_v7 = vld [vmem:[#allocation2 + $0x110] sm:$0xff] }
  0x73   : > { %v577_v21 = vmul.f32 %v1467_v54, %v1816_v45  ;;  %v1021_v23 = vadd.f32 %v817_v4, %v607_v51  ;;  %v780_v24 = vadd.f32 %v748_v5, %v712_v9  ;;  %v922_v14 = vadd.f32 %v890_v11, %v854_v12  ;;  %v1970_v4 = vld [vmem:[#allocation2 + $0x111] sm:$0xff] }
  0x74   : > { %v645_v29 = vmul.f32 %v1438_v38, %v1858_v20  ;;  %v541_v30 = vadd.f32 %v509_v22, %v473_v18  ;;  %v681_v26 = vmul.f32 %v1448_v43, %v1862_v8  ;;  %v749_v27 = vmul.f32 %v1457_v48, %v1870_v36 }
  0x75   : > { %v855_v25 = vmul.f32 %v1440_v39, %v1912_v13  ;;  %v1053_v45 = vadd.f32 %v1021_v23, %v989_v10  ;;  %v818_v40 = vadd.f32 %v1496_v19, %v780_v24  ;;  %v990_v41 = vadd.f32 %v958_v16, %v922_v14 }
  0x76   : > { %v891_v32 = vmul.f32 %v1450_v44, %v1916_v15  ;;  %v609_v34 = vadd.f32 %v577_v21, %v541_v30  ;;  %v713_v31 = vadd.f32 %v681_v26, %v645_v29  ;;  %v959_v50 = vmul.f32 %v1459_v49, %v1924_v28  ;;  %v1978_v21 = vld [vmem:[#allocation2 + $0x112] sm:$0xff] }
  0x77   : > { %v474_v47 = vmul.f32 %v1427_v33, %v1831_v59  ;;  %1085 = vst.msk [vmem:[%s1532_s30 + $0x78] sm:$0xff] %vm237_vm0, %v1053_v45  ;;  %v1022_v42 = vadd.f32 %v818_v40, %v608_v17  ;;  %v510_v55 = vmul.f32 %v1436_v37, %v1837_v60  ;;  %v578_v63 = vmul.f32 %v1467_v54, %v1839_v6  ;;  %v1993_v40 = vld [vmem:[#allocation2 + $0x120] sm:$0xff] }
  0x78   : > { %v923_v51 = vadd.f32 %v891_v32, %v855_v25  ;;  %v781_v52 = vadd.f32 %v749_v27, %v713_v31  ;;  %v646_v61 = vmul.f32 %v1438_v38, %v1885_v53  ;;  %v682_v59 = vmul.f32 %v1448_v43, %v1891_v56  ;;  %v1999_v31 = vld [vmem:[#allocation2 + $0x121] sm:$0xff] }
  0x79   : > { %v750_v62 = vmul.f32 %v1457_v48, %v1893_v0  ;;  %v1054_v58 = vadd.f32 %v1022_v42, %v990_v41  ;;  %v542_v1 = vadd.f32 %v510_v55, %v474_v47  ;;  %v856_v5 = vmul.f32 %v1440_v39, %v1939_v46 }
  0x7a   : > { %v991_v2 = vadd.f32 %v959_v50, %v923_v51  ;;  %v819_v60 = vadd.f32 %v1496_v19, %v781_v52  ;;  %v714_v3 = vadd.f32 %v682_v59, %v646_v61  ;;  %v892_v6 = vmul.f32 %v1450_v44, %v1945_v35  ;;  %v2001_v50 = vld [vmem:[#allocation2 + $0x122] sm:$0xff] }
  0x7b   : > { %v960_v10 = vmul.f32 %v1459_v49, %v1947_v57  ;;  %1086 = vst.msk [vmem:[%s1532_s30 + $0x80] sm:$0xff] %vm237_vm0, %v1054_v58  ;;  %v610_v12 = vadd.f32 %v578_v63, %v542_v1  ;;  %v475_v9 = vmul.f32 %v1427_v33, %v1858_v20  ;;  %v511_v11 = vmul.f32 %v1436_v37, %v1862_v8  ;;  %v2020_v1 = vld [vmem:[#allocation2 + $0x128] sm:$0xff] }
  0x7c   : > { %v579_v16 = vmul.f32 %v1467_v54, %v1870_v36  ;;  %v1023_v17 = vadd.f32 %v819_v60, %v609_v34  ;;  %v782_v18 = vadd.f32 %v750_v62, %v714_v3  ;;  %v924_v22 = vadd.f32 %v892_v6, %v856_v5  ;;  %v2024_v60 = vld [vmem:[#allocation2 + $0x129] sm:$0xff] }
  0x7d   : > { %v647_v23 = vmul.f32 %v1438_v38, %v1912_v13  ;;  %v543_v24 = vadd.f32 %v511_v11, %v475_v9  ;;  %v683_v14 = vmul.f32 %v1448_v43, %v1916_v15  ;;  %v751_v20 = vmul.f32 %v1457_v48, %v1924_v28 }
  0x7e   : > { %v857_v8 = vmul.f32 %v1440_v39, %v1966_v7  ;;  %v1055_v36 = vadd.f32 %v1023_v17, %v991_v2  ;;  %v820_v29 = vadd.f32 %v1496_v19, %v782_v18  ;;  %v992_v30 = vadd.f32 %v960_v10, %v924_v22 }
  0x7f   : > { %v893_v26 = vmul.f32 %v1450_v44, %v1970_v4  ;;  %v611_v27 = vadd.f32 %v579_v16, %v543_v24  ;;  %v715_v25 = vadd.f32 %v683_v14, %v647_v23  ;;  %v961_v45 = vmul.f32 %v1459_v49, %v1978_v21  ;;  %v2032_v16 = vld [vmem:[#allocation2 + $0x12a] sm:$0xff] }
  0x80   : > { %v476_v41 = vmul.f32 %v1427_v33, %v1885_v53  ;;  %1087 = vst.msk [vmem:[%s1532_s30 + $0x88] sm:$0xff] %vm237_vm0, %v1055_v36  ;;  %v1024_v32 = vadd.f32 %v820_v29, %v610_v12  ;;  %v512_v47 = vmul.f32 %v1436_v37, %v1891_v56  ;;  %v580_v42 = vmul.f32 %v1467_v54, %v1893_v0  ;;  %v2047_v29 = vld [vmem:[#allocation2 + $0x138] sm:$0xff] }
  0x81   : > { %v925_v34 = vadd.f32 %v893_v26, %v857_v8  ;;  %v783_v51 = vadd.f32 %v751_v20, %v715_v25  ;;  %v648_v55 = vmul.f32 %v1438_v38, %v1939_v46  ;;  %v684_v53 = vmul.f32 %v1448_v43, %v1945_v35  ;;  %v2053_v25 = vld [vmem:[#allocation2 + $0x139] sm:$0xff] }
  0x82   : > { %v752_v63 = vmul.f32 %v1457_v48, %v1947_v57  ;;  %v1056_v52 = vadd.f32 %v1024_v32, %v992_v30  ;;  %v544_v59 = vadd.f32 %v512_v47, %v476_v41  ;;  %v858_v62 = vmul.f32 %v1440_v39, %v1993_v40 }
  0x83   : > { %v993_v61 = vadd.f32 %v961_v45, %v925_v34  ;;  %v821_v56 = vadd.f32 %v1496_v19, %v783_v51  ;;  %v716_v58 = vadd.f32 %v684_v53, %v648_v55  ;;  %v894_v0 = vmul.f32 %v1450_v44, %v1999_v31  ;;  %v2055_v45 = vld [vmem:[#allocation2 + $0x13a] sm:$0xff] }
  0x84   : > { %v962_v2 = vmul.f32 %v1459_v49, %v2001_v50  ;;  %1088 = vst.msk [vmem:[%s1532_s30 + $0x90] sm:$0xff] %vm237_vm0, %v1056_v52  ;;  %v612_v5 = vadd.f32 %v580_v42, %v544_v59  ;;  %v477_v3 = vmul.f32 %v1427_v33, %v1912_v13  ;;  %v513_v6 = vmul.f32 %v1436_v37, %v1916_v15  ;;  %v2074_v59 = vld [vmem:[#allocation2 + $0x140] sm:$0xff] }
  0x85   : > { %v581_v10 = vmul.f32 %v1467_v54, %v1924_v28  ;;  %v1025_v12 = vadd.f32 %v821_v56, %v611_v27  ;;  %v784_v9 = vadd.f32 %v752_v63, %v716_v58  ;;  %v926_v11 = vadd.f32 %v894_v0, %v858_v62  ;;  %v2078_v56 = vld [vmem:[#allocation2 + $0x141] sm:$0xff] }
  0x86   : > { %v649_v17 = vmul.f32 %v1438_v38, %v1966_v7  ;;  %v545_v18 = vadd.f32 %v513_v6, %v477_v3  ;;  %v685_v22 = vmul.f32 %v1448_v43, %v1970_v4  ;;  %v753_v13 = vmul.f32 %v1457_v48, %v1978_v21 }
  0x87   : > { %v859_v15 = vmul.f32 %v1440_v39, %v2020_v1  ;;  %v1057_v28 = vadd.f32 %v1025_v12, %v993_v61  ;;  %v822_v23 = vadd.f32 %v1496_v19, %v784_v9  ;;  %v994_v24 = vadd.f32 %v962_v2, %v926_v11 }
  0x88   : > { %v895_v14 = vmul.f32 %v1450_v44, %v2024_v60  ;;  %v613_v20 = vadd.f32 %v581_v10, %v545_v18  ;;  %v717_v8 = vadd.f32 %v685_v22, %v649_v17  ;;  %v963_v36 = vmul.f32 %v1459_v49, %v2032_v16  ;;  %v2086_v10 = vld [vmem:[#allocation2 + $0x142] sm:$0xff] }
  0x89   : > { %v478_v30 = vmul.f32 %v1427_v33, %v1939_v46  ;;  %1089 = vst.msk [vmem:[%s1532_s30 + $0x98] sm:$0xff] %vm237_vm0, %v1057_v28  ;;  %v1026_v26 = vadd.f32 %v822_v23, %v612_v5  ;;  %v514_v41 = vmul.f32 %v1436_v37, %v1945_v35  ;;  %v582_v32 = vmul.f32 %v1467_v54, %v1947_v57  ;;  %v2101_v23 = vld [vmem:[#allocation2 + $0x150] sm:$0xff] }
  0x8a   : > { %v927_v27 = vadd.f32 %v895_v14, %v859_v15  ;;  %v785_v34 = vadd.f32 %v753_v13, %v717_v8  ;;  %v650_v47 = vmul.f32 %v1438_v38, %v1993_v40  ;;  %v686_v46 = vmul.f32 %v1448_v43, %v1999_v31  ;;  %v2107_v8 = vld [vmem:[#allocation2 + $0x151] sm:$0xff] }
  0x8b   : > { %v754_v42 = vmul.f32 %v1457_v48, %v2001_v50  ;;  %v1058_v51 = vadd.f32 %v1026_v26, %v994_v24  ;;  %v546_v53 = vadd.f32 %v514_v41, %v478_v30  ;;  %v860_v63 = vmul.f32 %v1440_v39, %v2047_v29 }
  0x8c   : > { %v995_v55 = vadd.f32 %v963_v36, %v927_v27  ;;  %v823_v35 = vadd.f32 %v1496_v19, %v785_v34  ;;  %v718_v52 = vadd.f32 %v686_v46, %v650_v47  ;;  %v896_v57 = vmul.f32 %v1450_v44, %v2053_v25 }
  0x8d   : > { %v964_v61 = vmul.f32 %v1459_v49, %v2055_v45  ;;  %1090 = vst.msk [vmem:[%s1532_s30 + $0xa0] sm:$0xff] %vm237_vm0, %v1058_v51  ;;  %v614_v62 = vadd.f32 %v582_v32, %v546_v53  ;;  %v479_v58 = vmul.f32 %v1427_v33, %v1966_v7  ;;  %v515_v0 = vmul.f32 %v1436_v37, %v1970_v4  ;;  %v2133_v53 = vld [vmem:[#allocation2 + $0x158] sm:$0xff] }
  0x8e   : > { %v583_v2 = vmul.f32 %v1467_v54, %v1978_v21  ;;  %v1027_v5 = vadd.f32 %v823_v35, %v613_v20  ;;  %v786_v3 = vadd.f32 %v754_v42, %v718_v52  ;;  %v928_v6 = vadd.f32 %v896_v57, %v860_v63  ;;  %v2137_v35 = vld [vmem:[#allocation2 + $0x159] sm:$0xff] }
  0x8f   : > { %v651_v12 = vmul.f32 %v1438_v38, %v2020_v1  ;;  %v547_v9 = vadd.f32 %v515_v0, %v479_v58  ;;  %v687_v11 = vmul.f32 %v1448_v43, %v2024_v60  ;;  %v755_v7 = vmul.f32 %v1457_v48, %v2032_v16 }
  0x90   : > { %v861_v4 = vmul.f32 %v1440_v39, %v2074_v59  ;;  %v1059_v21 = vadd.f32 %v1027_v5, %v995_v55  ;;  %v824_v17 = vadd.f32 %v1496_v19, %v786_v3  ;;  %v996_v18 = vadd.f32 %v964_v61, %v928_v6  ;;  %v2109_v19 = vld [vmem:[#allocation2 + $0x152] sm:$0xff] }
  0x91   : > { %v897_v22 = vmul.f32 %v1450_v44, %v2078_v56  ;;  %v615_v13 = vadd.f32 %v583_v2, %v547_v9  ;;  %v719_v15 = vadd.f32 %v687_v11, %v651_v12  ;;  %v965_v28 = vmul.f32 %v1459_v49, %v2086_v10  ;;  %v2145_v2 = vld [vmem:[#allocation2 + $0x15a] sm:$0xff] }
  0x92   : > { %v480_v24 = vmul.f32 %v1427_v33, %v1993_v40  ;;  %1091 = vst.msk [vmem:[%s1532_s30 + $0xa8] sm:$0xff] %vm237_vm0, %v1059_v21  ;;  %v1028_v14 = vadd.f32 %v824_v17, %v614_v62  ;;  %v516_v36 = vmul.f32 %v1436_v37, %v1999_v31  ;;  %v584_v30 = vmul.f32 %v1467_v54, %v2001_v50  ;;  %v2126_v50 = vld [vmem:[%s2298_s2] ss:$0 sm:$0xff]  ;;  %v2160_v17 = vld [vmem:[#allocation2 + $0x168] sm:$0xff] }
  0x93   : > { %v929_v20 = vadd.f32 %v897_v22, %v861_v4  ;;  %v787_v26 = vadd.f32 %v755_v7, %v719_v15  ;;  %v652_v27 = vmul.f32 %v1438_v38, %v2047_v29  ;;  %v688_v40 = vmul.f32 %v1448_v43, %v2053_v25  ;;  %v2166_v15 = vld [vmem:[#allocation2 + $0x169] sm:$0xff] }
  0x94   : > { %v756_v41 = vmul.f32 %v1457_v48, %v2055_v45  ;;  %v1060_v32 = vadd.f32 %v1028_v14, %v996_v18  ;;  %v548_v47 = vadd.f32 %v516_v36, %v480_v24  ;;  %v862_v31 = vmul.f32 %v1440_v39, %v2101_v23 }
  0x95   : > { %v997_v34 = vadd.f32 %v965_v28, %v929_v20  ;;  %v825_v46 = vadd.f32 %v2126_v50, %v787_v26  ;;  %v720_v42 = vadd.f32 %v688_v40, %v652_v27  ;;  %v898_v51 = vmul.f32 %v1450_v44, %v2107_v8  ;;  %v2168_v28 = vld [vmem:[#allocation2 + $0x16a] sm:$0xff] }
  0x96   : > { %v966_v55 = vmul.f32 %v1459_v49, %v2109_v19  ;;  %1092 = vst.msk [vmem:[%s1532_s30 + $0xb0] sm:$0xff] %vm237_vm0, %v1060_v32  ;;  %v616_v63 = vadd.f32 %v584_v30, %v548_v47  ;;  %v481_v52 = vmul.f32 %v1427_v33, %v2020_v1  ;;  %v517_v57 = vmul.f32 %v1436_v37, %v2024_v60  ;;  %v2187_v47 = vld [vmem:[#allocation2 + $0x170] sm:$0xff] }
  0x97   : > { %v585_v61 = vmul.f32 %v1467_v54, %v2032_v16  ;;  %v1029_v62 = vadd.f32 %v825_v46, %v615_v13  ;;  %v788_v58 = vadd.f32 %v756_v41, %v720_v42  ;;  %v930_v0 = vadd.f32 %v898_v51, %v862_v31  ;;  %v2191_v46 = vld [vmem:[#allocation2 + $0x171] sm:$0xff] }
  0x98   : > { %v653_v5 = vmul.f32 %v1438_v38, %v2074_v59  ;;  %v549_v3 = vadd.f32 %v517_v57, %v481_v52  ;;  %v689_v6 = vmul.f32 %v1448_v43, %v2078_v56  ;;  %v757_v1 = vmul.f32 %v1457_v48, %v2086_v10 }
  0x99   : > { %v863_v60 = vmul.f32 %v1440_v39, %v2133_v53  ;;  %v1061_v16 = vadd.f32 %v1029_v62, %v997_v34  ;;  %v826_v12 = vadd.f32 %v2126_v50, %v788_v58  ;;  %v998_v9 = vadd.f32 %v966_v55, %v930_v0 }
  0x9a   : > { %v899_v11 = vmul.f32 %v1450_v44, %v2137_v35  ;;  %v617_v7 = vadd.f32 %v585_v61, %v549_v3  ;;  %v721_v4 = vadd.f32 %v689_v6, %v653_v5  ;;  %v967_v21 = vmul.f32 %v1459_v49, %v2145_v2  ;;  %v2199_v61 = vld [vmem:[#allocation2 + $0x172] sm:$0xff] }
  0x9b   : > { %v482_v18 = vmul.f32 %v1427_v33, %v2047_v29  ;;  %1093 = vst.msk [vmem:[%s1532_s30 + $0xb8] sm:$0xff] %vm237_vm0, %v1061_v16  ;;  %v1030_v22 = vadd.f32 %v826_v12, %v616_v63  ;;  %v518_v24 = vmul.f32 %v1436_v37, %v2053_v25  ;;  %v586_v14 = vmul.f32 %v1467_v54, %v2055_v45 }
  0x9c   : > { %v931_v13 = vadd.f32 %v899_v11, %v863_v60  ;;  %v789_v20 = vadd.f32 %v757_v1, %v721_v4  ;;  %v654_v36 = vmul.f32 %v1438_v38, %v2101_v23  ;;  %v690_v29 = vmul.f32 %v1448_v43, %v2107_v8  ;;  %v376_v1 = vld [vmem:[#allocation2 + $0x180] sm:$0xff] }
  0x9d   : > { %v758_v30 = vmul.f32 %v1457_v48, %v2109_v19  ;;  %v1062_v26 = vadd.f32 %v1030_v22, %v998_v9  ;;  %v550_v40 = vadd.f32 %v518_v24, %v482_v18  ;;  %v864_v41 = vmul.f32 %v1440_v39, %v2160_v17  ;;  %v412_v9 = vld [vmem:[#allocation2 + $0x181] sm:$0xff] }
  0x9e   : > { %v999_v27 = vadd.f32 %v967_v21, %v931_v13  ;;  %v827_v25 = vadd.f32 %v2126_v50, %v789_v20  ;;  %v722_v32 = vadd.f32 %v690_v29, %v654_v36  ;;  %v900_v45 = vmul.f32 %v1450_v44, %v2166_v15  ;;  %v448_v21 = vld [vmem:[#allocation2 + $0x182] sm:$0xff] }
  0x9f   : > { %v968_v34 = vmul.f32 %v1459_v49, %v2168_v28  ;;  %1094 = vst.msk [vmem:[%s1532_s30 + $0xc0] sm:$0xff] %vm237_vm0, %v1062_v26  ;;  %v618_v31 = vadd.f32 %v586_v14, %v550_v40  ;;  %v483_v42 = vmul.f32 %v1427_v33, %v2074_v59  ;;  %v519_v51 = vmul.f32 %v1436_v37, %v2078_v56  ;;  %v377_v40 = vld [vmem:[#allocation2 + $0x188] sm:$0xff] }
  0xa0   : > { %v587_v55 = vmul.f32 %v1467_v54, %v2086_v10  ;;  %v1031_v63 = vadd.f32 %v827_v25, %v617_v7  ;;  %v790_v52 = vadd.f32 %v758_v30, %v722_v32  ;;  %v932_v57 = vadd.f32 %v900_v45, %v864_v41 }
  0xa1   : > { %v655_v62 = vmul.f32 %v1438_v38, %v2133_v53  ;;  %v551_v58 = vadd.f32 %v519_v51, %v483_v42  ;;  %v691_v0 = vmul.f32 %v1448_v43, %v2137_v35  ;;  %v759_v59 = vmul.f32 %v1457_v48, %v2145_v2  ;;  %v413_v42 = vld [vmem:[#allocation2 + $0x189] sm:$0xff] }
  0xa2   : > { %v865_v56 = vmul.f32 %v1440_v39, %v2187_v47  ;;  %v1063_v10 = vadd.f32 %v1031_v63, %v999_v27  ;;  %v828_v5 = vadd.f32 %v2126_v50, %v790_v52  ;;  %v1000_v3 = vadd.f32 %v968_v34, %v932_v57  ;;  %v449_v51 = vld [vmem:[#allocation2 + $0x18a] sm:$0xff] }
  0xa3   : > { %v901_v6 = vmul.f32 %v1450_v44, %v2191_v46  ;;  %v619_v60 = vadd.f32 %v587_v55, %v551_v58  ;;  %v723_v16 = vadd.f32 %v691_v0, %v655_v62  ;;  %v969_v12 = vmul.f32 %v1459_v49, %v2199_v61 }
  0xa4   : > { %v484_v11 = vmul.f32 %v1427_v33, %v2101_v23  ;;  %1095 = vst.msk [vmem:[%s1532_s30 + $0xc8] sm:$0xff] %vm237_vm0, %v1063_v10  ;;  %v1032_v7 = vadd.f32 %v828_v5, %v618_v31  ;;  %v520_v18 = vmul.f32 %v1436_v37, %v2107_v8  ;;  %v588_v22 = vmul.f32 %v1467_v54, %v2109_v19 }
  0xa5   : > { %v933_v4 = vadd.f32 %v901_v6, %v865_v56  ;;  %v791_v13 = vadd.f32 %v759_v59, %v723_v16  ;;  %v656_v24 = vmul.f32 %v1438_v38, %v2160_v17  ;;  %v658_v14 = vmul.f32 %v1438_v38, %v376_v1  ;;  %v414_v16 = vld [vmem:[#allocation2 + $0x199] sm:$0xff] }
  0xa6   : > { %v692_v23 = vmul.f32 %v1448_v43, %v2166_v15  ;;  %v1064_v20 = vadd.f32 %v1032_v7, %v1000_v3  ;;  %v552_v29 = vadd.f32 %v520_v18, %v484_v11  ;;  %v694_v30 = vmul.f32 %v1448_v43, %v412_v9 }
  0xa7   : > { %v1001_v36 = vadd.f32 %v969_v12, %v933_v4  ;;  %v829_v26 = vadd.f32 %v2126_v50, %v791_v13  ;;  %v760_v19 = vmul.f32 %v1457_v48, %v2168_v28  ;;  %v762_v27 = vmul.f32 %v1457_v48, %v448_v21 }
  0xa8   : > { %v724_v8 = vadd.f32 %v692_v23, %v656_v24  ;;  %1096 = vst.msk [vmem:[%s1532_s30 + $0xd0] sm:$0xff] %vm237_vm0, %v1064_v20  ;;  %v620_v41 = vadd.f32 %v588_v22, %v552_v29  ;;  %v866_v25 = vmul.f32 %v1440_v39, %v376_v1  ;;  %v902_v32 = vmul.f32 %v1450_v44, %v412_v9  ;;  %v415_v29 = vld [vmem:[#allocation2 + $0x1a1] sm:$0xff] }
  0xa9   : > { %v970_v45 = vmul.f32 %v1459_v49, %v448_v21  ;;  %v1033_v34 = vadd.f32 %v829_v26, %v619_v60  ;;  %v485_v55 = vmul.f32 %v1427_v33, %v2133_v53  ;;  %v521_v63 = vmul.f32 %v1436_v37, %v2137_v35  ;;  %v378_v60 = vld [vmem:[#allocation2 + $0x198] sm:$0xff] }
  0xaa   : > { %v792_v31 = vadd.f32 %v760_v19, %v724_v8  ;;  %v934_v52 = vadd.f32 %v902_v32, %v866_v25  ;;  %v589_v57 = vmul.f32 %v1467_v54, %v2145_v2  ;;  %v657_v62 = vmul.f32 %v1438_v38, %v2187_v47  ;;  %v451_v8 = vld [vmem:[#allocation2 + $0x1a2] sm:$0xff] }
  0xab   : > { %v659_v58 = vmul.f32 %v1438_v38, %v377_v40  ;;  %v1065_v0 = vadd.f32 %v1033_v34, %v1001_v36  ;;  %v553_v56 = vadd.f32 %v521_v63, %v485_v55  ;;  %v693_v10 = vmul.f32 %v1448_v43, %v2191_v46 }
  0xac   : > { %v830_v59 = vadd.f32 %v2126_v50, %v792_v31  ;;  %v1002_v53 = vadd.f32 %v970_v45, %v934_v52  ;;  %v695_v5 = vmul.f32 %v1448_v43, %v413_v42  ;;  %v761_v35 = vmul.f32 %v1457_v48, %v2199_v61  ;;  %v450_v43 = vld [vmem:[#allocation2 + $0x19a] sm:$0xff] }
  0xad   : > { %v763_v2 = vmul.f32 %v1457_v48, %v449_v51  ;;  %1097 = vst.msk [vmem:[%s1532_s30 + $0xd8] sm:$0xff] %vm237_vm0, %v1065_v0  ;;  %v621_v6 = vadd.f32 %v589_v57, %v553_v56  ;;  %v725_v38 = vadd.f32 %v693_v10, %v657_v62  ;;  %v867_v1 = vmul.f32 %v1440_v39, %v377_v40 }
  0xae   : > { %v1034_v3 = vadd.f32 %v830_v59, %v620_v41  ;;  %v903_v12 = vmul.f32 %v1450_v44, %v413_v42  ;;  %v971_v9 = vmul.f32 %v1459_v49, %v449_v51  ;;  %v486_v11 = vmul.f32 %v1427_v33, %v2160_v17 }
  0xaf   : > { %v522_v48 = vmul.f32 %v1436_v37, %v2166_v15  ;;  %v793_v4 = vadd.f32 %v761_v35, %v725_v38  ;;  %v590_v21 = vmul.f32 %v1467_v54, %v2168_v28  ;;  %v726_v18 = vadd.f32 %v694_v30, %v658_v14  ;;  %v379_v15 = vld [vmem:[#allocation2 + $0x1a0] sm:$0xff] }
  0xb0   : > { %v1066_v7 = vadd.f32 %v1034_v3, %v1002_v53  ;;  %v935_v22 = vadd.f32 %v903_v12, %v867_v1  ;;  %v868_v24 = vmul.f32 %v1440_v39, %v378_v60  ;;  %v904_v23 = vmul.f32 %v1450_v44, %v414_v16 }
  0xb1   : > { %v554_v13 = vadd.f32 %v522_v48, %v486_v11  ;;  %v831_v20 = vadd.f32 %v2126_v50, %v793_v4  ;;  %v794_v17 = vadd.f32 %v762_v27, %v726_v18  ;;  %v972_v36 = vmul.f32 %v1459_v49, %v450_v43 }
  0xb2   : > { %1098 = vst.msk [vmem:[%s1532_s30 + $0xe0] sm:$0xff] %vm237_vm0, %v1066_v7  ;;  %v487_v26 = vmul.f32 %v1427_v33, %v2187_v47  ;;  %v1003_v28 = vadd.f32 %v971_v9, %v935_v22  ;;  %v936_v30 = vadd.f32 %v904_v23, %v868_v24  ;;  %v523_v19 = vmul.f32 %v1436_v37, %v2191_v46 }
  0xb3   : > { %v622_v14 = vadd.f32 %v590_v21, %v554_v13  ;;  %v1035_v40 = vadd.f32 %v831_v20, %v621_v6  ;;  %v832_v41 = vadd.f32 %v2126_v50, %v794_v17  ;;  %v591_v27 = vmul.f32 %v1467_v54, %v2199_v61 }
  0xb4   : > { %v727_v25 = vadd.f32 %v695_v5, %v659_v58  ;;  %v1004_v32 = vadd.f32 %v972_v36, %v936_v30  ;;  %v555_v45 = vadd.f32 %v523_v19, %v487_v26  ;;  %v869_v33 = vmul.f32 %v1440_v39, %v379_v15 }
  0xb5   : > { %v905_v47 = vmul.f32 %v1450_v44, %v415_v29  ;;  %v1067_v34 = vadd.f32 %v1035_v40, %v1003_v28  ;;  %v1036_v31 = vadd.f32 %v832_v41, %v622_v14  ;;  %v973_v37 = vmul.f32 %v1459_v49, %v451_v8 }
  0xb6   : > { %v795_v42 = vadd.f32 %v763_v2, %v727_v25  ;;  %v623_v55 = vadd.f32 %v591_v27, %v555_v45 }
  0xb7   : > { %v937_v46 = vadd.f32 %v905_v47, %v869_v33  ;;  %1099 = vst.msk [vmem:[%s1532_s30 + $0xe8] sm:$0xff] %vm237_vm0, %v1067_v34  ;;  %v1068_v51 = vadd.f32 %v1036_v31, %v1004_v32 }
  0xb8   : > { %v833_v54 = vadd.f32 %v2126_v50, %v795_v42 }
  0xb9   : > { %1100 = vst.msk [vmem:[%s1532_s30 + $0xf0] sm:$0xff] %vm237_vm0, %v1068_v51  ;;  %v1005_v61 = vadd.f32 %v973_v37, %v937_v46 }
  0xba   : > { %v1037_v63 = vadd.f32 %v833_v54, %v623_v55 }
  0xbc   : > { %v1069_v52 = vadd.f32 %v1037_v63, %v1005_v61 }
  0xbe   : > { %1101 = vst.msk [vmem:[%s1532_s30 + $0xf8] sm:$0xff] %vm237_vm0, %v1069_v52 }
  0xbf PF: > { %s13_s14 = sadd.s32 1, %s1277_s14   ;;  %s2300_s12 = smov %s1273_s13 }
  0xc0   : > { %p10_p5 = scmp.ge.s32.totalorder %s13_s14, 4   ;;  %s2301_s13 = smov %s2303_s15 }
  0xc2   :  { %12 = sbr.rel (!%p10_p5) target bundleno = 2 (0x2), region = 70 }

</bundles_post_ra>
